<compile_context>
chip_gen: v7x
topology: tpu7x:2x2x1
jax: 0.10.0
libtpu: 0.0.40
codegen_flags: <defaults>
</compile_context>

<pallas_src>
import math
import jax
import jax.numpy as jnp
from jax.experimental import pallas as pl
from jax.experimental.pallas import tpu as pltpu

MXU_DTYPE = jnp.bfloat16          # matmul operand dtype (accumulation stays f32)


# ----------------------------- shared math core ------------------------------
# The same jnp-level code is traced both inside the Pallas kernel (on values
# read from VMEM refs) and in the pure-JAX reference (under vmap), so the two
# paths compute identical math up to accumulation order.

def _mm(a, w):
    """[M, K] f32 @ [K, N] bf16 -> f32.  K == 1 stays on the VPU, else MXU."""
    if a.shape[-1] == 1:
        return a * w.astype(jnp.float32)
    return jnp.dot(a.astype(MXU_DTYPE), w, preferred_element_type=jnp.float32)


def _conv_from_taps(get_tap, w, b, k, d):
    """Causal dilated conv: y[t] = sum_j W_j @ a[t - (k-1-j)*d] + b.

    get_tap(s) -> input activation delayed by s steps (zeros for t < s),
    shape [L, cin] f32.  w: [k, cin, cout] bf16, b: [1, cout] f32.
    """
    acc = _mm(get_tap(0), w[k - 1]) + b     # current tap; bias broadcast hoisted (once)
    for j in range(k - 1):
        acc = acc + _mm(get_tap((k - 1 - j) * d), w[j])
    return acc


def _pool_head(a, wfc, bfc, step, T):
    """Fused avg_pool1d(step, step) + Conv1d(C -> n_out, kernel_size=T) head.

    a: [L, C] f32, wfc: [T, C, n_out] bf16, bfc: [1, n_out] f32 -> [1, n_out].
    The single head output position is accumulated per pooled time step, which
    avoids any in-kernel [T, C] -> [1, T*C] relayout.  (For very large T this
    loop would move to a grid axis / fori_loop.)
    """
    inv = 1.0 / float(step)
    # TODO(synk): TCN.dropout (p=0.5) after the pool is train-mode stochastic; eval == identity.
    acc = bfc
    for t in range(T):
        seg = a[t * step:(t + 1) * step, :]                       # [step, C]
        pooled_t = jnp.sum(seg, axis=0, keepdims=True) * inv      # [1, C] f32
        acc = acc + jnp.dot(pooled_t.astype(MXU_DTYPE), wfc[t],
                            preferred_element_type=jnp.float32)
    return acc


def _tcn_body(x, weights, cfgs, step, T, conv_fn):
    """Full TCN forward for one sample.  x: [L, 1] f32 -> [1, n_out] f32."""
    it = iter(weights)
    a = x
    for bi, (k, d, cin, cout, has_ds) in enumerate(cfgs):
        w1, b1, w2, b2 = next(it), next(it), next(it), next(it)
        wds, bds = (next(it), next(it)) if has_ds else (None, None)
        h1 = jnp.maximum(conv_fn(2 * bi, a, w1, b1, k, d), 0.0)
        # TODO(synk): TemporalBlock dropout (p=0.2) is train-mode stochastic; eval == identity.
        h2 = jnp.maximum(conv_fn(2 * bi + 1, h1, w2, b2, k, d), 0.0)
        res = (_mm(a, wds) + bds) if has_ds else a   # fused 1x1 downsample / identity
        a = jnp.maximum(h2 + res, 0.0)
    wfc, bfc = next(it), next(it)
    return _pool_head(a, wfc, bfc, step, T)


# --------------------------- kernel / reference convs ------------------------

def _scratch_conv(a, s_ref, w, b, k, d):
    """Kernel-side causal conv: shifted taps are read from a zero-padded VMEM
    scratch at static offsets (im2col fused into the GEMM, VMEM-only)."""
    L = a.shape[0]
    pad = (k - 1) * d
    if pad > 0:
        s_ref[0:pad, :] = jnp.zeros((pad, a.shape[1]), jnp.float32)
        s_ref[pad:pad + L, :] = a

    def get_tap(s):
        return a if s == 0 else s_ref[pad - s:pad - s + L, :]

    return _conv_from_taps(get_tap, w, b, k, d)


def _ref_conv(a, w, b, k, d):
    """Reference causal conv: shifted taps via zero-prepend + slice (plain XLA)."""
    L, cin = a.shape

    def get_tap(s):
        if s == 0:
            return a
        return jnp.concatenate(
            [jnp.zeros((s, cin), jnp.float32), a[:L - s, :]], axis=0)

    return _conv_from_taps(get_tap, w, b, k, d)


# ------------------------------ fused Pallas call -----------------------------

def _make_fused_kernel(cfgs, step, T, n_weights):
    def kernel(*refs):
        x_ref = refs[0]
        w_refs = refs[1:1 + n_weights]
        o_ref = refs[1 + n_weights]
        s_refs = refs[2 + n_weights:]
        weights = [r[...] for r in w_refs]            # a few KB, loaded once

        def conv_fn(ci, a, w, b, k, d):
            return _scratch_conv(a, s_refs[ci], w, b, k, d)

        out = _tcn_body(x_ref[0], weights, cfgs, step, T, conv_fn)
        o_ref[0] = out.astype(o_ref.dtype)

    return kernel


def _flatten_params(params):
    cfgs, args = [], []
    for blk in params['blocks']:
        k, cin, cout = (int(s) for s in blk['w1'].shape)
        d = int(blk['d'])
        has_ds = 'wds' in blk
        cfgs.append((k, d, cin, cout, has_ds))
        args += [blk['w1'], blk['b1'].reshape(1, cout),
                 blk['w2'], blk['b2'].reshape(1, cout)]
        if has_ds:
            args += [blk['wds'], blk['bds'].reshape(1, cout)]
    n_out = int(params['wfc'].shape[-1])
    args += [params['wfc'], params['bfc'].reshape(1, n_out)]
    return cfgs, args


def _const_spec(a):
    zeros = (0,) * a.ndim
    return pl.BlockSpec(a.shape, lambda n, _z=zeros: _z)


def tcn_forward(inputs, params):
    """Mirrors TCN.forward (eval mode).  inputs: [N, L_in] (or [N, 1, L_in])."""
    N = inputs.shape[0]
    x = inputs.reshape(N, -1, 1).astype(jnp.float32)      # channels-last [N, L, 1]
    L = int(x.shape[1])
    step = int(params['step'])
    T = L // step
    # TODO(synk): only the canonical case pooled_len == length (a single head
    # conv output position, reshaped to [N, 33]) is implemented.
    assert T == int(params['length']), "pooled length must equal the head kernel size"

    cfgs, wargs = _flatten_params(params)
    n_out = int(params['wfc'].shape[-1])

    in_specs = [pl.BlockSpec((1, L, 1), lambda n: (n, 0, 0))]
    in_specs += [_const_spec(a) for a in wargs]

    # One zero-padded f32 VMEM scratch per causal conv (shifted taps read at
    # static offsets).  Total scratch is a few tens of KB even for the
    # canonical shapes -- far below v7x's 64 MiB VMEM.
    scratch_shapes = []
    for (k, d, cin, cout, _) in cfgs:
        pad = (k - 1) * d
        scratch_shapes.append(pltpu.VMEM((pad + L, cin), jnp.float32))
        scratch_shapes.append(pltpu.VMEM((pad + L, cout), jnp.float32))

    out = pl.pallas_call(
        _make_fused_kernel(cfgs, step, T, len(wargs)),
        out_shape=jax.ShapeDtypeStruct((N, 1, n_out), jnp.float32),
        grid=(N,),                        # >=2 parallel steps -> both v7x TCs busy
        in_specs=in_specs,
        out_specs=pl.BlockSpec((1, 1, n_out), lambda n: (n, 0, 0)),
        scratch_shapes=scratch_shapes,
        compiler_params=pltpu.CompilerParams(
            dimension_semantics=("parallel",)),
    )(x, *wargs)
    return out.reshape(N, n_out)


def tcn_reference(inputs, params):
    """Pure-JAX reference (same math as the kernel, vmapped over the batch)."""
    N = inputs.shape[0]
    x = inputs.reshape(N, -1, 1).astype(jnp.float32)
    L = int(x.shape[1])
    step = int(params['step'])
    T = L // step
    cfgs, wargs = _flatten_params(params)

    def conv_fn(ci, a, w, b, k, d):
        return _ref_conv(a, w, b, k, d)

    def one(xi):
        return _tcn_body(xi, list(wargs), cfgs, step, T, conv_fn)[0]

    return jax.vmap(one)(x)


# -------------------------------- parameters ---------------------------------

def init_tcn_params(key, input_size=1, num_channels=(16, 32, 32), kernel_size=2,
                    length=8, step=4, n_out=33):
    keys = iter(jax.random.split(key, 64))

    def conv_bias(k, fan_in, c):
        bound = 1.0 / math.sqrt(fan_in)                   # PyTorch Conv1d default
        return jax.random.uniform(k, (c,), jnp.float32, -bound, bound)

    blocks = []
    cin = input_size
    for i, cout in enumerate(num_channels):
        d = kernel_size ** i
        blk = {
            'k': kernel_size, 'd': d,
            # PyTorch init: conv weights ~ N(0, 0.01); layout [tap, Cin, Cout].
            'w1': (0.01 * jax.random.normal(next(keys), (kernel_size, cin, cout),
                                            jnp.float32)).astype(MXU_DTYPE),
            'b1': conv_bias(next(keys), cin * kernel_size, cout),
            'w2': (0.01 * jax.random.normal(next(keys), (kernel_size, cout, cout),
                                            jnp.float32)).astype(MXU_DTYPE),
            'b2': conv_bias(next(keys), cout * kernel_size, cout),
        }
        if cin != cout:
            blk['wds'] = (0.01 * jax.random.normal(next(keys), (cin, cout),
                                                   jnp.float32)).astype(MXU_DTYPE)
            blk['bds'] = conv_bias(next(keys), cin, cout)
        blocks.append(blk)
        cin = cout

    # Head: Conv1d(C_last -> n_out, kernel_size=length) over the pooled sequence
    # (pooled_len == length => single output position).  Layout [t, Cin, n_out].
    fan_in, fan_out = cin * length, n_out * length
    bound = math.sqrt(6.0 / (fan_in + fan_out))           # xavier_uniform
    wfc = jax.random.uniform(next(keys), (length, cin, n_out), jnp.float32,
                             -bound, bound)
    bfc = conv_bias(next(keys), fan_in, n_out)
    return {'blocks': blocks, 'wfc': wfc.astype(MXU_DTYPE), 'bfc': bfc,
            'length': length, 'step': step}


# ---------------------------------- main --------------------------------------

if __name__ == "__main__":
    key = jax.random.PRNGKey(0)
    pkey, xkey = jax.random.split(key)
    length, step = 8, 4                                   # small config; L_in = length*step
    num_channels = (16, 32, 32)                           # covers both residual paths
    params = init_tcn_params(pkey, input_size=1, num_channels=num_channels,
                             kernel_size=2, length=length, step=step, n_out=33)
    x = jax.random.normal(xkey, (2, length * step), jnp.float32)   # (N=2, L_in=32)

    fwd = jax.jit(lambda inp: tcn_forward(inp, params))
    out = fwd(x)
    jax.block_until_ready(out)
    assert out.shape == (2, 33)

    ref = jax.jit(lambda inp: tcn_reference(inp, params))(x)
    jax.block_until_ready(ref)
    assert jnp.allclose(out, ref, rtol=1e-3, atol=1e-3), (
        "max|diff| = %e" % float(jnp.max(jnp.abs(out - ref))))
    print("KERNEL_OK")
</pallas_src>

<mosaic_0001>
module attributes {stable_mosaic.version = 11 : i64} {
  func.func @kernel(%arg0: i32, %arg1: memref<1x32x1xf32, #tpu.memory_space<vmem>>, %arg2: memref<2x1x16xbf16, #tpu.memory_space<vmem>>, %arg3: memref<1x16xf32, #tpu.memory_space<vmem>>, %arg4: memref<2x16x16xbf16, #tpu.memory_space<vmem>>, %arg5: memref<1x16xf32, #tpu.memory_space<vmem>>, %arg6: memref<1x16xbf16, #tpu.memory_space<vmem>>, %arg7: memref<1x16xf32, #tpu.memory_space<vmem>>, %arg8: memref<2x16x32xbf16, #tpu.memory_space<vmem>>, %arg9: memref<1x32xf32, #tpu.memory_space<vmem>>, %arg10: memref<2x32x32xbf16, #tpu.memory_space<vmem>>, %arg11: memref<1x32xf32, #tpu.memory_space<vmem>>, %arg12: memref<16x32xbf16, #tpu.memory_space<vmem>>, %arg13: memref<1x32xf32, #tpu.memory_space<vmem>>, %arg14: memref<2x32x32xbf16, #tpu.memory_space<vmem>>, %arg15: memref<1x32xf32, #tpu.memory_space<vmem>>, %arg16: memref<2x32x32xbf16, #tpu.memory_space<vmem>>, %arg17: memref<1x32xf32, #tpu.memory_space<vmem>>, %arg18: memref<8x32x33xbf16, #tpu.memory_space<vmem>>, %arg19: memref<1x33xf32, #tpu.memory_space<vmem>>, %arg20: memref<1x1x33xf32, #tpu.memory_space<vmem>>, %arg21: memref<33x1xf32, #tpu.memory_space<vmem>>, %arg22: memref<33x16xf32, #tpu.memory_space<vmem>>, %arg23: memref<34x16xf32, #tpu.memory_space<vmem>>, %arg24: memref<34x32xf32, #tpu.memory_space<vmem>>, %arg25: memref<36x32xf32, #tpu.memory_space<vmem>>, %arg26: memref<36x32xf32, #tpu.memory_space<vmem>>) attributes {dimension_semantics = [#tpu.dimension_semantics<parallel>], iteration_bounds = array<i64: 2>, scalar_prefetch = 0 : i64, scratch_operands = 6 : i64, tpu.core_type = #tpu.core_type<tc>, window_params = [{transform_indices = @transform_0, window_bounds = array<i64: 1, 32, 1>}, {pipeline_mode = #tpu.pipeline_mode<synchronous>, transform_indices = @transform_1, window_bounds = array<i64: 2, 1, 16>}, {pipeline_mode = #tpu.pipeline_mode<synchronous>, transform_indices = @transform_2, window_bounds = array<i64: 1, 16>}, {pipeline_mode = #tpu.pipeline_mode<synchronous>, transform_indices = @transform_3, window_bounds = array<i64: 2, 16, 16>}, {pipeline_mode = #tpu.pipeline_mode<synchronous>, transform_indices = @transform_4, window_bounds = array<i64: 1, 16>}, {pipeline_mode = #tpu.pipeline_mode<synchronous>, transform_indices = @transform_5, window_bounds = array<i64: 1, 16>}, {pipeline_mode = #tpu.pipeline_mode<synchronous>, transform_indices = @transform_6, window_bounds = array<i64: 1, 16>}, {pipeline_mode = #tpu.pipeline_mode<synchronous>, transform_indices = @transform_7, window_bounds = array<i64: 2, 16, 32>}, {pipeline_mode = #tpu.pipeline_mode<synchronous>, transform_indices = @transform_8, window_bounds = array<i64: 1, 32>}, {pipeline_mode = #tpu.pipeline_mode<synchronous>, transform_indices = @transform_9, window_bounds = array<i64: 2, 32, 32>}, {pipeline_mode = #tpu.pipeline_mode<synchronous>, transform_indices = @transform_10, window_bounds = array<i64: 1, 32>}, {pipeline_mode = #tpu.pipeline_mode<synchronous>, transform_indices = @transform_11, window_bounds = array<i64: 16, 32>}, {pipeline_mode = #tpu.pipeline_mode<synchronous>, transform_indices = @transform_12, window_bounds = array<i64: 1, 32>}, {pipeline_mode = #tpu.pipeline_mode<synchronous>, transform_indices = @transform_13, window_bounds = array<i64: 2, 32, 32>}, {pipeline_mode = #tpu.pipeline_mode<synchronous>, transform_indices = @transform_14, window_bounds = array<i64: 1, 32>}, {pipeline_mode = #tpu.pipeline_mode<synchronous>, transform_indices = @transform_15, window_bounds = array<i64: 2, 32, 32>}, {pipeline_mode = #tpu.pipeline_mode<synchronous>, transform_indices = @transform_16, window_bounds = array<i64: 1, 32>}, {pipeline_mode = #tpu.pipeline_mode<synchronous>, transform_indices = @transform_17, window_bounds = array<i64: 8, 32, 33>}, {pipeline_mode = #tpu.pipeline_mode<synchronous>, transform_indices = @transform_18, window_bounds = array<i64: 1, 33>}, {transform_indices = @transform_19, window_bounds = array<i64: 1, 1, 33>}]} {
    %c0 = arith.constant 0 : index
    %c0_0 = arith.constant 0 : index
    %c0_1 = arith.constant 0 : index
    %0 = vector.load %arg2[%c0, %c0_0, %c0_1] : memref<2x1x16xbf16, #tpu.memory_space<vmem>>, vector<2x1x16xbf16>
    %c0_2 = arith.constant 0 : index
    %c0_3 = arith.constant 0 : index
    %1 = vector.load %arg3[%c0_2, %c0_3] : memref<1x16xf32, #tpu.memory_space<vmem>>, vector<1x16xf32>
    %c0_4 = arith.constant 0 : index
    %c0_5 = arith.constant 0 : index
    %c0_6 = arith.constant 0 : index
    %2 = vector.load %arg4[%c0_4, %c0_5, %c0_6] : memref<2x16x16xbf16, #tpu.memory_space<vmem>>, vector<2x16x16xbf16>
    %c0_7 = arith.constant 0 : index
    %c0_8 = arith.constant 0 : index
    %3 = vector.load %arg5[%c0_7, %c0_8] : memref<1x16xf32, #tpu.memory_space<vmem>>, vector<1x16xf32>
    %c0_9 = arith.constant 0 : index
    %c0_10 = arith.constant 0 : index
    %4 = vector.load %arg6[%c0_9, %c0_10] : memref<1x16xbf16, #tpu.memory_space<vmem>>, vector<1x16xbf16>
    %c0_11 = arith.constant 0 : index
    %c0_12 = arith.constant 0 : index
    %5 = vector.load %arg7[%c0_11, %c0_12] : memref<1x16xf32, #tpu.memory_space<vmem>>, vector<1x16xf32>
    %c0_13 = arith.constant 0 : index
    %c0_14 = arith.constant 0 : index
    %c0_15 = arith.constant 0 : index
    %6 = vector.load %arg8[%c0_13, %c0_14, %c0_15] : memref<2x16x32xbf16, #tpu.memory_space<vmem>>, vector<2x16x32xbf16>
    %c0_16 = arith.constant 0 : index
    %c0_17 = arith.constant 0 : index
    %7 = vector.load %arg9[%c0_16, %c0_17] : memref<1x32xf32, #tpu.memory_space<vmem>>, vector<1x32xf32>
    %c0_18 = arith.constant 0 : index
    %c0_19 = arith.constant 0 : index
    %c0_20 = arith.constant 0 : index
    %8 = vector.load %arg10[%c0_18, %c0_19, %c0_20] : memref<2x32x32xbf16, #tpu.memory_space<vmem>>, vector<2x32x32xbf16>
    %c0_21 = arith.constant 0 : index
    %c0_22 = arith.constant 0 : index
    %9 = vector.load %arg11[%c0_21, %c0_22] : memref<1x32xf32, #tpu.memory_space<vmem>>, vector<1x32xf32>
    %c0_23 = arith.constant 0 : index
    %c0_24 = arith.constant 0 : index
    %10 = vector.load %arg12[%c0_23, %c0_24] : memref<16x32xbf16, #tpu.memory_space<vmem>>, vector<16x32xbf16>
    %c0_25 = arith.constant 0 : index
    %c0_26 = arith.constant 0 : index
    %11 = vector.load %arg13[%c0_25, %c0_26] : memref<1x32xf32, #tpu.memory_space<vmem>>, vector<1x32xf32>
    %c0_27 = arith.constant 0 : index
    %c0_28 = arith.constant 0 : index
    %c0_29 = arith.constant 0 : index
    %12 = vector.load %arg14[%c0_27, %c0_28, %c0_29] : memref<2x32x32xbf16, #tpu.memory_space<vmem>>, vector<2x32x32xbf16>
    %c0_30 = arith.constant 0 : index
    %c0_31 = arith.constant 0 : index
    %13 = vector.load %arg15[%c0_30, %c0_31] : memref<1x32xf32, #tpu.memory_space<vmem>>, vector<1x32xf32>
    %c0_32 = arith.constant 0 : index
    %c0_33 = arith.constant 0 : index
    %c0_34 = arith.constant 0 : index
    %14 = vector.load %arg16[%c0_32, %c0_33, %c0_34] : memref<2x32x32xbf16, #tpu.memory_space<vmem>>, vector<2x32x32xbf16>
    %c0_35 = arith.constant 0 : index
    %c0_36 = arith.constant 0 : index
    %15 = vector.load %arg17[%c0_35, %c0_36] : memref<1x32xf32, #tpu.memory_space<vmem>>, vector<1x32xf32>
    %c0_37 = arith.constant 0 : index
    %c0_38 = arith.constant 0 : index
    %c0_39 = arith.constant 0 : index
    %16 = vector.load %arg18[%c0_37, %c0_38, %c0_39] : memref<8x32x33xbf16, #tpu.memory_space<vmem>>, vector<8x32x33xbf16>
    %c0_40 = arith.constant 0 : index
    %c0_41 = arith.constant 0 : index
    %17 = vector.load %arg19[%c0_40, %c0_41] : memref<1x33xf32, #tpu.memory_space<vmem>>, vector<1x33xf32>
    %c0_42 = arith.constant 0 : index
    %c0_43 = arith.constant 0 : index
    %c0_44 = arith.constant 0 : index
    %18 = vector.load %arg1[%c0_42, %c0_43, %c0_44] : memref<1x32x1xf32, #tpu.memory_space<vmem>>, vector<1x32x1xf32>
    %19 = vector.shape_cast %18 : vector<1x32x1xf32> to vector<32x1xf32>
    %cst = arith.constant 0.000000e+00 : f32
    %20 = vector.broadcast %cst : f32 to vector<1x1xf32>
    %c0_45 = arith.constant 0 : index
    %c0_46 = arith.constant 0 : index
    %21 = vector.load %arg21[%c0_45, %c0_46] : memref<33x1xf32, #tpu.memory_space<vmem>>, vector<1x1xf32>
    tpu.vector_store %arg21[%c0_45, %c0_46], %20 {strides = array<i32>} : memref<33x1xf32, #tpu.memory_space<vmem>>, vector<1x1xf32>,
    %c1 = arith.constant 1 : index
    %c0_47 = arith.constant 0 : index
    %22 = vector.load %arg21[%c1, %c0_47] : memref<33x1xf32, #tpu.memory_space<vmem>>, vector<32x1xf32>
    tpu.vector_store %arg21[%c1, %c0_47], %19 {strides = array<i32>} : memref<33x1xf32, #tpu.memory_space<vmem>>, vector<32x1xf32>,
    %23 = vector.extract_strided_slice %0 {offsets = [1, 0, 0], sizes = [1, 1, 16], strides = [1, 1, 1]} : vector<2x1x16xbf16> to vector<1x1x16xbf16>
    %24 = vector.shape_cast %23 : vector<1x1x16xbf16> to vector<1x16xbf16>
    %25 = arith.extf %24 : vector<1x16xbf16> to vector<1x16xf32>
    %26 = vector.broadcast %19 : vector<32x1xf32> to vector<32x16xf32>
    %27 = vector.broadcast %25 : vector<1x16xf32> to vector<32x16xf32>
    %28 = arith.mulf %26, %27 : vector<32x16xf32>
    %29 = vector.broadcast %1 : vector<1x16xf32> to vector<32x16xf32>
    %30 = arith.addf %28, %29 : vector<32x16xf32>
    %c0_48 = arith.constant 0 : index
    %c0_49 = arith.constant 0 : index
    %31 = vector.load %arg21[%c0_48, %c0_49] : memref<33x1xf32, #tpu.memory_space<vmem>>, vector<32x1xf32>
    %32 = vector.extract_strided_slice %0 {offsets = [0, 0, 0], sizes = [1, 1, 16], strides = [1, 1, 1]} : vector<2x1x16xbf16> to vector<1x1x16xbf16>
    %33 = vector.shape_cast %32 : vector<1x1x16xbf16> to vector<1x16xbf16>
    %34 = arith.extf %33 : vector<1x16xbf16> to vector<1x16xf32>
    %35 = vector.broadcast %31 : vector<32x1xf32> to vector<32x16xf32>
    %36 = vector.broadcast %34 : vector<1x16xf32> to vector<32x16xf32>
    %37 = arith.mulf %35, %36 : vector<32x16xf32>
    %38 = arith.addf %30, %37 : vector<32x16xf32>
    %cst_50 = arith.constant 0.000000e+00 : f32
    %39 = vector.broadcast %cst_50 : f32 to vector<32x16xf32>
    %40 = arith.maximumf %38, %39 : vector<32x16xf32>
    %cst_51 = arith.constant 0.000000e+00 : f32
    %41 = vector.broadcast %cst_51 : f32 to vector<1x16xf32>
    %c0_52 = arith.constant 0 : index
    %c0_53 = arith.constant 0 : index
    %42 = vector.load %arg22[%c0_52, %c0_53] : memref<33x16xf32, #tpu.memory_space<vmem>>, vector<1x16xf32>
    tpu.vector_store %arg22[%c0_52, %c0_53], %41 {strides = array<i32>} : memref<33x16xf32, #tpu.memory_space<vmem>>, vector<1x16xf32>,
    %c1_54 = arith.constant 1 : index
    %c0_55 = arith.constant 0 : index
    %43 = vector.load %arg22[%c1_54, %c0_55] : memref<33x16xf32, #tpu.memory_space<vmem>>, vector<32x16xf32>
    tpu.vector_store %arg22[%c1_54, %c0_55], %40 {strides = array<i32>} : memref<33x16xf32, #tpu.memory_space<vmem>>, vector<32x16xf32>,
    %44 = vector.extract_strided_slice %2 {offsets = [1, 0, 0], sizes = [1, 16, 16], strides = [1, 1, 1]} : vector<2x16x16xbf16> to vector<1x16x16xbf16>
    %45 = vector.shape_cast %44 : vector<1x16x16xbf16> to vector<16x16xbf16>
    %46 = arith.truncf %40 : vector<32x16xf32> to vector<32x16xbf16>
    %cst_56 = arith.constant dense<0.000000e+00> : vector<32x16xf32>
    %47 = tpu.matmul %46, %45, %cst_56 {dimension_numbers = #tpu.dot_dimension_numbers<[1], [0], [0], [1], [0, 0, 1, 1], [], []>} : vector<32x16xbf16>, vector<16x16xbf16>, vector<32x16xf32> -> vector<32x16xf32>
    %48 = vector.broadcast %3 : vector<1x16xf32> to vector<32x16xf32>
    %49 = arith.addf %47, %48 : vector<32x16xf32>
    %c0_57 = arith.constant 0 : index
    %c0_58 = arith.constant 0 : index
    %50 = vector.load %arg22[%c0_57, %c0_58] : memref<33x16xf32, #tpu.memory_space<vmem>>, vector<32x16xf32>
    %51 = vector.extract_strided_slice %2 {offsets = [0, 0, 0], sizes = [1, 16, 16], strides = [1, 1, 1]} : vector<2x16x16xbf16> to vector<1x16x16xbf16>
    %52 = vector.shape_cast %51 : vector<1x16x16xbf16> to vector<16x16xbf16>
    %53 = arith.truncf %50 : vector<32x16xf32> to vector<32x16xbf16>
    %cst_59 = arith.constant dense<0.000000e+00> : vector<32x16xf32>
    %54 = tpu.matmul %53, %52, %cst_59 {dimension_numbers = #tpu.dot_dimension_numbers<[1], [0], [0], [1], [0, 0, 1, 1], [], []>} : vector<32x16xbf16>, vector<16x16xbf16>, vector<32x16xf32> -> vector<32x16xf32>
    %55 = arith.addf %49, %54 : vector<32x16xf32>
    %cst_60 = arith.constant 0.000000e+00 : f32
    %56 = vector.broadcast %cst_60 : f32 to vector<32x16xf32>
    %57 = arith.maximumf %55, %56 : vector<32x16xf32>
    %58 = arith.extf %4 : vector<1x16xbf16> to vector<1x16xf32>
    %59 = vector.broadcast %19 : vector<32x1xf32> to vector<32x16xf32>
    %60 = vector.broadcast %58 : vector<1x16xf32> to vector<32x16xf32>
    %61 = arith.mulf %59, %60 : vector<32x16xf32>
    %62 = vector.broadcast %5 : vector<1x16xf32> to vector<32x16xf32>
    %63 = arith.addf %61, %62 : vector<32x16xf32>
    %64 = arith.addf %57, %63 : vector<32x16xf32>
    %cst_61 = arith.constant 0.000000e+00 : f32
    %65 = vector.broadcast %cst_61 : f32 to vector<32x16xf32>
    %66 = arith.maximumf %64, %65 : vector<32x16xf32>
    %cst_62 = arith.constant 0.000000e+00 : f32
    %67 = vector.broadcast %cst_62 : f32 to vector<2x16xf32>
    %c0_63 = arith.constant 0 : index
    %c0_64 = arith.constant 0 : index
    %68 = vector.load %arg23[%c0_63, %c0_64] : memref<34x16xf32, #tpu.memory_space<vmem>>, vector<2x16xf32>
    tpu.vector_store %arg23[%c0_63, %c0_64], %67 {strides = array<i32>} : memref<34x16xf32, #tpu.memory_space<vmem>>, vector<2x16xf32>,
    %c2 = arith.constant 2 : index
    %c0_65 = arith.constant 0 : index
    %69 = vector.load %arg23[%c2, %c0_65] : memref<34x16xf32, #tpu.memory_space<vmem>>, vector<32x16xf32>
    tpu.vector_store %arg23[%c2, %c0_65], %66 {strides = array<i32>} : memref<34x16xf32, #tpu.memory_space<vmem>>, vector<32x16xf32>,
    %70 = vector.extract_strided_slice %6 {offsets = [1, 0, 0], sizes = [1, 16, 32], strides = [1, 1, 1]} : vector<2x16x32xbf16> to vector<1x16x32xbf16>
    %71 = vector.shape_cast %70 : vector<1x16x32xbf16> to vector<16x32xbf16>
    %72 = arith.truncf %66 : vector<32x16xf32> to vector<32x16xbf16>
    %cst_66 = arith.constant dense<0.000000e+00> : vector<32x32xf32>
    %73 = tpu.matmul %72, %71, %cst_66 {dimension_numbers = #tpu.dot_dimension_numbers<[1], [0], [0], [1], [0, 0, 1, 1], [], []>} : vector<32x16xbf16>, vector<16x32xbf16>, vector<32x32xf32> -> vector<32x32xf32>
    %74 = vector.broadcast %7 : vector<1x32xf32> to vector<32x32xf32>
    %75 = arith.addf %73, %74 : vector<32x32xf32>
    %c0_67 = arith.constant 0 : index
    %c0_68 = arith.constant 0 : index
    %76 = vector.load %arg23[%c0_67, %c0_68] : memref<34x16xf32, #tpu.memory_space<vmem>>, vector<32x16xf32>
    %77 = vector.extract_strided_slice %6 {offsets = [0, 0, 0], sizes = [1, 16, 32], strides = [1, 1, 1]} : vector<2x16x32xbf16> to vector<1x16x32xbf16>
    %78 = vector.shape_cast %77 : vector<1x16x32xbf16> to vector<16x32xbf16>
    %79 = arith.truncf %76 : vector<32x16xf32> to vector<32x16xbf16>
    %cst_69 = arith.constant dense<0.000000e+00> : vector<32x32xf32>
    %80 = tpu.matmul %79, %78, %cst_69 {dimension_numbers = #tpu.dot_dimension_numbers<[1], [0], [0], [1], [0, 0, 1, 1], [], []>} : vector<32x16xbf16>, vector<16x32xbf16>, vector<32x32xf32> -> vector<32x32xf32>
    %81 = arith.addf %75, %80 : vector<32x32xf32>
    %cst_70 = arith.constant 0.000000e+00 : f32
    %82 = vector.broadcast %cst_70 : f32 to vector<32x32xf32>
    %83 = arith.maximumf %81, %82 : vector<32x32xf32>
    %cst_71 = arith.constant 0.000000e+00 : f32
    %84 = vector.broadcast %cst_71 : f32 to vector<2x32xf32>
    %c0_72 = arith.constant 0 : index
    %c0_73 = arith.constant 0 : index
    %85 = vector.load %arg24[%c0_72, %c0_73] : memref<34x32xf32, #tpu.memory_space<vmem>>, vector<2x32xf32>
    tpu.vector_store %arg24[%c0_72, %c0_73], %84 {strides = array<i32>} : memref<34x32xf32, #tpu.memory_space<vmem>>, vector<2x32xf32>,
    %c2_74 = arith.constant 2 : index
    %c0_75 = arith.constant 0 : index
    %86 = vector.load %arg24[%c2_74, %c0_75] : memref<34x32xf32, #tpu.memory_space<vmem>>, vector<32x32xf32>
    tpu.vector_store %arg24[%c2_74, %c0_75], %83 {strides = array<i32>} : memref<34x32xf32, #tpu.memory_space<vmem>>, vector<32x32xf32>,
    %87 = vector.extract_strided_slice %8 {offsets = [1, 0, 0], sizes = [1, 32, 32], strides = [1, 1, 1]} : vector<2x32x32xbf16> to vector<1x32x32xbf16>
    %88 = vector.shape_cast %87 : vector<1x32x32xbf16> to vector<32x32xbf16>
    %89 = arith.truncf %83 : vector<32x32xf32> to vector<32x32xbf16>
    %cst_76 = arith.constant dense<0.000000e+00> : vector<32x32xf32>
    %90 = tpu.matmul %89, %88, %cst_76 {dimension_numbers = #tpu.dot_dimension_numbers<[1], [0], [0], [1], [0, 0, 1, 1], [], []>} : vector<32x32xbf16>, vector<32x32xbf16>, vector<32x32xf32> -> vector<32x32xf32>
    %91 = vector.broadcast %9 : vector<1x32xf32> to vector<32x32xf32>
    %92 = arith.addf %90, %91 : vector<32x32xf32>
    %c0_77 = arith.constant 0 : index
    %c0_78 = arith.constant 0 : index
    %93 = vector.load %arg24[%c0_77, %c0_78] : memref<34x32xf32, #tpu.memory_space<vmem>>, vector<32x32xf32>
    %94 = vector.extract_strided_slice %8 {offsets = [0, 0, 0], sizes = [1, 32, 32], strides = [1, 1, 1]} : vector<2x32x32xbf16> to vector<1x32x32xbf16>
    %95 = vector.shape_cast %94 : vector<1x32x32xbf16> to vector<32x32xbf16>
    %96 = arith.truncf %93 : vector<32x32xf32> to vector<32x32xbf16>
    %cst_79 = arith.constant dense<0.000000e+00> : vector<32x32xf32>
    %97 = tpu.matmul %96, %95, %cst_79 {dimension_numbers = #tpu.dot_dimension_numbers<[1], [0], [0], [1], [0, 0, 1, 1], [], []>} : vector<32x32xbf16>, vector<32x32xbf16>, vector<32x32xf32> -> vector<32x32xf32>
    %98 = arith.addf %92, %97 : vector<32x32xf32>
    %cst_80 = arith.constant 0.000000e+00 : f32
    %99 = vector.broadcast %cst_80 : f32 to vector<32x32xf32>
    %100 = arith.maximumf %98, %99 : vector<32x32xf32>
    %101 = arith.truncf %66 : vector<32x16xf32> to vector<32x16xbf16>
    %cst_81 = arith.constant dense<0.000000e+00> : vector<32x32xf32>
    %102 = tpu.matmul %101, %10, %cst_81 {dimension_numbers = #tpu.dot_dimension_numbers<[1], [0], [0], [1], [0, 0, 1, 1], [], []>} : vector<32x16xbf16>, vector<16x32xbf16>, vector<32x32xf32> -> vector<32x32xf32>
    %103 = vector.broadcast %11 : vector<1x32xf32> to vector<32x32xf32>
    %104 = arith.addf %102, %103 : vector<32x32xf32>
    %105 = arith.addf %100, %104 : vector<32x32xf32>
    %cst_82 = arith.constant 0.000000e+00 : f32
    %106 = vector.broadcast %cst_82 : f32 to vector<32x32xf32>
    %107 = arith.maximumf %105, %106 : vector<32x32xf32>
    %cst_83 = arith.constant 0.000000e+00 : f32
    %108 = vector.broadcast %cst_83 : f32 to vector<4x32xf32>
    %c0_84 = arith.constant 0 : index
    %c0_85 = arith.constant 0 : index
    %109 = vector.load %arg25[%c0_84, %c0_85] : memref<36x32xf32, #tpu.memory_space<vmem>>, vector<4x32xf32>
    tpu.vector_store %arg25[%c0_84, %c0_85], %108 {strides = array<i32>} : memref<36x32xf32, #tpu.memory_space<vmem>>, vector<4x32xf32>,
    %c4 = arith.constant 4 : index
    %c0_86 = arith.constant 0 : index
    %110 = vector.load %arg25[%c4, %c0_86] : memref<36x32xf32, #tpu.memory_space<vmem>>, vector<32x32xf32>
    tpu.vector_store %arg25[%c4, %c0_86], %107 {strides = array<i32>} : memref<36x32xf32, #tpu.memory_space<vmem>>, vector<32x32xf32>,
    %111 = vector.extract_strided_slice %12 {offsets = [1, 0, 0], sizes = [1, 32, 32], strides = [1, 1, 1]} : vector<2x32x32xbf16> to vector<1x32x32xbf16>
    %112 = vector.shape_cast %111 : vector<1x32x32xbf16> to vector<32x32xbf16>
    %113 = arith.truncf %107 : vector<32x32xf32> to vector<32x32xbf16>
    %cst_87 = arith.constant dense<0.000000e+00> : vector<32x32xf32>
    %114 = tpu.matmul %113, %112, %cst_87 {dimension_numbers = #tpu.dot_dimension_numbers<[1], [0], [0], [1], [0, 0, 1, 1], [], []>} : vector<32x32xbf16>, vector<32x32xbf16>, vector<32x32xf32> -> vector<32x32xf32>
    %115 = vector.broadcast %13 : vector<1x32xf32> to vector<32x32xf32>
    %116 = arith.addf %114, %115 : vector<32x32xf32>
    %c0_88 = arith.constant 0 : index
    %c0_89 = arith.constant 0 : index
    %117 = vector.load %arg25[%c0_88, %c0_89] : memref<36x32xf32, #tpu.memory_space<vmem>>, vector<32x32xf32>
    %118 = vector.extract_strided_slice %12 {offsets = [0, 0, 0], sizes = [1, 32, 32], strides = [1, 1, 1]} : vector<2x32x32xbf16> to vector<1x32x32xbf16>
    %119 = vector.shape_cast %118 : vector<1x32x32xbf16> to vector<32x32xbf16>
    %120 = arith.truncf %117 : vector<32x32xf32> to vector<32x32xbf16>
    %cst_90 = arith.constant dense<0.000000e+00> : vector<32x32xf32>
    %121 = tpu.matmul %120, %119, %cst_90 {dimension_numbers = #tpu.dot_dimension_numbers<[1], [0], [0], [1], [0, 0, 1, 1], [], []>} : vector<32x32xbf16>, vector<32x32xbf16>, vector<32x32xf32> -> vector<32x32xf32>
    %122 = arith.addf %116, %121 : vector<32x32xf32>
    %cst_91 = arith.constant 0.000000e+00 : f32
    %123 = vector.broadcast %cst_91 : f32 to vector<32x32xf32>
    %124 = arith.maximumf %122, %123 : vector<32x32xf32>
    %cst_92 = arith.constant 0.000000e+00 : f32
    %125 = vector.broadcast %cst_92 : f32 to vector<4x32xf32>
    %c0_93 = arith.constant 0 : index
    %c0_94 = arith.constant 0 : index
    %126 = vector.load %arg26[%c0_93, %c0_94] : memref<36x32xf32, #tpu.memory_space<vmem>>, vector<4x32xf32>
    tpu.vector_store %arg26[%c0_93, %c0_94], %125 {strides = array<i32>} : memref<36x32xf32, #tpu.memory_space<vmem>>, vector<4x32xf32>,
    %c4_95 = arith.constant 4 : index
    %c0_96 = arith.constant 0 : index
    %127 = vector.load %arg26[%c4_95, %c0_96] : memref<36x32xf32, #tpu.memory_space<vmem>>, vector<32x32xf32>
    tpu.vector_store %arg26[%c4_95, %c0_96], %124 {strides = array<i32>} : memref<36x32xf32, #tpu.memory_space<vmem>>, vector<32x32xf32>,
    %128 = vector.extract_strided_slice %14 {offsets = [1, 0, 0], sizes = [1, 32, 32], strides = [1, 1, 1]} : vector<2x32x32xbf16> to vector<1x32x32xbf16>
    %129 = vector.shape_cast %128 : vector<1x32x32xbf16> to vector<32x32xbf16>
    %130 = arith.truncf %124 : vector<32x32xf32> to vector<32x32xbf16>
    %cst_97 = arith.constant dense<0.000000e+00> : vector<32x32xf32>
    %131 = tpu.matmul %130, %129, %cst_97 {dimension_numbers = #tpu.dot_dimension_numbers<[1], [0], [0], [1], [0, 0, 1, 1], [], []>} : vector<32x32xbf16>, vector<32x32xbf16>, vector<32x32xf32> -> vector<32x32xf32>
    %132 = vector.broadcast %15 : vector<1x32xf32> to vector<32x32xf32>
    %133 = arith.addf %131, %132 : vector<32x32xf32>
    %c0_98 = arith.constant 0 : index
    %c0_99 = arith.constant 0 : index
    %134 = vector.load %arg26[%c0_98, %c0_99] : memref<36x32xf32, #tpu.memory_space<vmem>>, vector<32x32xf32>
    %135 = vector.extract_strided_slice %14 {offsets = [0, 0, 0], sizes = [1, 32, 32], strides = [1, 1, 1]} : vector<2x32x32xbf16> to vector<1x32x32xbf16>
    %136 = vector.shape_cast %135 : vector<1x32x32xbf16> to vector<32x32xbf16>
    %137 = arith.truncf %134 : vector<32x32xf32> to vector<32x32xbf16>
    %cst_100 = arith.constant dense<0.000000e+00> : vector<32x32xf32>
    %138 = tpu.matmul %137, %136, %cst_100 {dimension_numbers = #tpu.dot_dimension_numbers<[1], [0], [0], [1], [0, 0, 1, 1], [], []>} : vector<32x32xbf16>, vector<32x32xbf16>, vector<32x32xf32> -> vector<32x32xf32>
    %139 = arith.addf %133, %138 : vector<32x32xf32>
    %cst_101 = arith.constant 0.000000e+00 : f32
    %140 = vector.broadcast %cst_101 : f32 to vector<32x32xf32>
    %141 = arith.maximumf %139, %140 : vector<32x32xf32>
    %142 = arith.addf %141, %107 : vector<32x32xf32>
    %cst_102 = arith.constant 0.000000e+00 : f32
    %143 = vector.broadcast %cst_102 : f32 to vector<32x32xf32>
    %144 = arith.maximumf %142, %143 : vector<32x32xf32>
    %145 = vector.extract_strided_slice %144 {offsets = [0, 0], sizes = [4, 32], strides = [1, 1]} : vector<32x32xf32> to vector<4x32xf32>
    %cst_103 = arith.constant dense<0.000000e+00> : vector<32xf32>
    %146 = vector.multi_reduction <add>, %145, %cst_103 [0] : vector<4x32xf32> to vector<32xf32>
    %147 = vector.shape_cast %146 : vector<32xf32> to vector<1x32xf32>
    %cst_104 = arith.constant 2.500000e-01 : f32
    %148 = vector.broadcast %cst_104 : f32 to vector<1x32xf32>
    %149 = arith.mulf %147, %148 : vector<1x32xf32>
    %150 = arith.truncf %149 : vector<1x32xf32> to vector<1x32xbf16>
    %151 = vector.extract_strided_slice %16 {offsets = [0, 0, 0], sizes = [1, 32, 33], strides = [1, 1, 1]} : vector<8x32x33xbf16> to vector<1x32x33xbf16>
    %152 = vector.shape_cast %151 : vector<1x32x33xbf16> to vector<32x33xbf16>
    %cst_105 = arith.constant dense<0.000000e+00> : vector<1x33xf32>
    %153 = tpu.matmul %150, %152, %cst_105 {dimension_numbers = #tpu.dot_dimension_numbers<[1], [0], [0], [1], [0, 0, 1, 1], [], []>} : vector<1x32xbf16>, vector<32x33xbf16>, vector<1x33xf32> -> vector<1x33xf32>
    %154 = arith.addf %17, %153 : vector<1x33xf32>
    %155 = vector.extract_strided_slice %144 {offsets = [4, 0], sizes = [4, 32], strides = [1, 1]} : vector<32x32xf32> to vector<4x32xf32>
    %cst_106 = arith.constant dense<0.000000e+00> : vector<32xf32>
    %156 = vector.multi_reduction <add>, %155, %cst_106 [0] : vector<4x32xf32> to vector<32xf32>
    %157 = vector.shape_cast %156 : vector<32xf32> to vector<1x32xf32>
    %cst_107 = arith.constant 2.500000e-01 : f32
    %158 = vector.broadcast %cst_107 : f32 to vector<1x32xf32>
    %159 = arith.mulf %157, %158 : vector<1x32xf32>
    %160 = arith.truncf %159 : vector<1x32xf32> to vector<1x32xbf16>
    %161 = vector.extract_strided_slice %16 {offsets = [1, 0, 0], sizes = [1, 32, 33], strides = [1, 1, 1]} : vector<8x32x33xbf16> to vector<1x32x33xbf16>
    %162 = vector.shape_cast %161 : vector<1x32x33xbf16> to vector<32x33xbf16>
    %cst_108 = arith.constant dense<0.000000e+00> : vector<1x33xf32>
    %163 = tpu.matmul %160, %162, %cst_108 {dimension_numbers = #tpu.dot_dimension_numbers<[1], [0], [0], [1], [0, 0, 1, 1], [], []>} : vector<1x32xbf16>, vector<32x33xbf16>, vector<1x33xf32> -> vector<1x33xf32>
    %164 = arith.addf %154, %163 : vector<1x33xf32>
    %165 = vector.extract_strided_slice %144 {offsets = [8, 0], sizes = [4, 32], strides = [1, 1]} : vector<32x32xf32> to vector<4x32xf32>
    %cst_109 = arith.constant dense<0.000000e+00> : vector<32xf32>
    %166 = vector.multi_reduction <add>, %165, %cst_109 [0] : vector<4x32xf32> to vector<32xf32>
    %167 = vector.shape_cast %166 : vector<32xf32> to vector<1x32xf32>
    %cst_110 = arith.constant 2.500000e-01 : f32
    %168 = vector.broadcast %cst_110 : f32 to vector<1x32xf32>
    %169 = arith.mulf %167, %168 : vector<1x32xf32>
    %170 = arith.truncf %169 : vector<1x32xf32> to vector<1x32xbf16>
    %171 = vector.extract_strided_slice %16 {offsets = [2, 0, 0], sizes = [1, 32, 33], strides = [1, 1, 1]} : vector<8x32x33xbf16> to vector<1x32x33xbf16>
    %172 = vector.shape_cast %171 : vector<1x32x33xbf16> to vector<32x33xbf16>
    %cst_111 = arith.constant dense<0.000000e+00> : vector<1x33xf32>
    %173 = tpu.matmul %170, %172, %cst_111 {dimension_numbers = #tpu.dot_dimension_numbers<[1], [0], [0], [1], [0, 0, 1, 1], [], []>} : vector<1x32xbf16>, vector<32x33xbf16>, vector<1x33xf32> -> vector<1x33xf32>
    %174 = arith.addf %164, %173 : vector<1x33xf32>
    %175 = vector.extract_strided_slice %144 {offsets = [12, 0], sizes = [4, 32], strides = [1, 1]} : vector<32x32xf32> to vector<4x32xf32>
    %cst_112 = arith.constant dense<0.000000e+00> : vector<32xf32>
    %176 = vector.multi_reduction <add>, %175, %cst_112 [0] : vector<4x32xf32> to vector<32xf32>
    %177 = vector.shape_cast %176 : vector<32xf32> to vector<1x32xf32>
    %cst_113 = arith.constant 2.500000e-01 : f32
    %178 = vector.broadcast %cst_113 : f32 to vector<1x32xf32>
    %179 = arith.mulf %177, %178 : vector<1x32xf32>
    %180 = arith.truncf %179 : vector<1x32xf32> to vector<1x32xbf16>
    %181 = vector.extract_strided_slice %16 {offsets = [3, 0, 0], sizes = [1, 32, 33], strides = [1, 1, 1]} : vector<8x32x33xbf16> to vector<1x32x33xbf16>
    %182 = vector.shape_cast %181 : vector<1x32x33xbf16> to vector<32x33xbf16>
    %cst_114 = arith.constant dense<0.000000e+00> : vector<1x33xf32>
    %183 = tpu.matmul %180, %182, %cst_114 {dimension_numbers = #tpu.dot_dimension_numbers<[1], [0], [0], [1], [0, 0, 1, 1], [], []>} : vector<1x32xbf16>, vector<32x33xbf16>, vector<1x33xf32> -> vector<1x33xf32>
    %184 = arith.addf %174, %183 : vector<1x33xf32>
    %185 = vector.extract_strided_slice %144 {offsets = [16, 0], sizes = [4, 32], strides = [1, 1]} : vector<32x32xf32> to vector<4x32xf32>
    %cst_115 = arith.constant dense<0.000000e+00> : vector<32xf32>
    %186 = vector.multi_reduction <add>, %185, %cst_115 [0] : vector<4x32xf32> to vector<32xf32>
    %187 = vector.shape_cast %186 : vector<32xf32> to vector<1x32xf32>
    %cst_116 = arith.constant 2.500000e-01 : f32
    %188 = vector.broadcast %cst_116 : f32 to vector<1x32xf32>
    %189 = arith.mulf %187, %188 : vector<1x32xf32>
    %190 = arith.truncf %189 : vector<1x32xf32> to vector<1x32xbf16>
    %191 = vector.extract_strided_slice %16 {offsets = [4, 0, 0], sizes = [1, 32, 33], strides = [1, 1, 1]} : vector<8x32x33xbf16> to vector<1x32x33xbf16>
    %192 = vector.shape_cast %191 : vector<1x32x33xbf16> to vector<32x33xbf16>
    %cst_117 = arith.constant dense<0.000000e+00> : vector<1x33xf32>
    %193 = tpu.matmul %190, %192, %cst_117 {dimension_numbers = #tpu.dot_dimension_numbers<[1], [0], [0], [1], [0, 0, 1, 1], [], []>} : vector<1x32xbf16>, vector<32x33xbf16>, vector<1x33xf32> -> vector<1x33xf32>
    %194 = arith.addf %184, %193 : vector<1x33xf32>
    %195 = vector.extract_strided_slice %144 {offsets = [20, 0], sizes = [4, 32], strides = [1, 1]} : vector<32x32xf32> to vector<4x32xf32>
    %cst_118 = arith.constant dense<0.000000e+00> : vector<32xf32>
    %196 = vector.multi_reduction <add>, %195, %cst_118 [0] : vector<4x32xf32> to vector<32xf32>
    %197 = vector.shape_cast %196 : vector<32xf32> to vector<1x32xf32>
    %cst_119 = arith.constant 2.500000e-01 : f32
    %198 = vector.broadcast %cst_119 : f32 to vector<1x32xf32>
    %199 = arith.mulf %197, %198 : vector<1x32xf32>
    %200 = arith.truncf %199 : vector<1x32xf32> to vector<1x32xbf16>
    %201 = vector.extract_strided_slice %16 {offsets = [5, 0, 0], sizes = [1, 32, 33], strides = [1, 1, 1]} : vector<8x32x33xbf16> to vector<1x32x33xbf16>
    %202 = vector.shape_cast %201 : vector<1x32x33xbf16> to vector<32x33xbf16>
    %cst_120 = arith.constant dense<0.000000e+00> : vector<1x33xf32>
    %203 = tpu.matmul %200, %202, %cst_120 {dimension_numbers = #tpu.dot_dimension_numbers<[1], [0], [0], [1], [0, 0, 1, 1], [], []>} : vector<1x32xbf16>, vector<32x33xbf16>, vector<1x33xf32> -> vector<1x33xf32>
    %204 = arith.addf %194, %203 : vector<1x33xf32>
    %205 = vector.extract_strided_slice %144 {offsets = [24, 0], sizes = [4, 32], strides = [1, 1]} : vector<32x32xf32> to vector<4x32xf32>
    %cst_121 = arith.constant dense<0.000000e+00> : vector<32xf32>
    %206 = vector.multi_reduction <add>, %205, %cst_121 [0] : vector<4x32xf32> to vector<32xf32>
    %207 = vector.shape_cast %206 : vector<32xf32> to vector<1x32xf32>
    %cst_122 = arith.constant 2.500000e-01 : f32
    %208 = vector.broadcast %cst_122 : f32 to vector<1x32xf32>
    %209 = arith.mulf %207, %208 : vector<1x32xf32>
    %210 = arith.truncf %209 : vector<1x32xf32> to vector<1x32xbf16>
    %211 = vector.extract_strided_slice %16 {offsets = [6, 0, 0], sizes = [1, 32, 33], strides = [1, 1, 1]} : vector<8x32x33xbf16> to vector<1x32x33xbf16>
    %212 = vector.shape_cast %211 : vector<1x32x33xbf16> to vector<32x33xbf16>
    %cst_123 = arith.constant dense<0.000000e+00> : vector<1x33xf32>
    %213 = tpu.matmul %210, %212, %cst_123 {dimension_numbers = #tpu.dot_dimension_numbers<[1], [0], [0], [1], [0, 0, 1, 1], [], []>} : vector<1x32xbf16>, vector<32x33xbf16>, vector<1x33xf32> -> vector<1x33xf32>
    %214 = arith.addf %204, %213 : vector<1x33xf32>
    %215 = vector.extract_strided_slice %144 {offsets = [28, 0], sizes = [4, 32], strides = [1, 1]} : vector<32x32xf32> to vector<4x32xf32>
    %cst_124 = arith.constant dense<0.000000e+00> : vector<32xf32>
    %216 = vector.multi_reduction <add>, %215, %cst_124 [0] : vector<4x32xf32> to vector<32xf32>
    %217 = vector.shape_cast %216 : vector<32xf32> to vector<1x32xf32>
    %cst_125 = arith.constant 2.500000e-01 : f32
    %218 = vector.broadcast %cst_125 : f32 to vector<1x32xf32>
    %219 = arith.mulf %217, %218 : vector<1x32xf32>
    %220 = arith.truncf %219 : vector<1x32xf32> to vector<1x32xbf16>
    %221 = vector.extract_strided_slice %16 {offsets = [7, 0, 0], sizes = [1, 32, 33], strides = [1, 1, 1]} : vector<8x32x33xbf16> to vector<1x32x33xbf16>
    %222 = vector.shape_cast %221 : vector<1x32x33xbf16> to vector<32x33xbf16>
    %cst_126 = arith.constant dense<0.000000e+00> : vector<1x33xf32>
    %223 = tpu.matmul %220, %222, %cst_126 {dimension_numbers = #tpu.dot_dimension_numbers<[1], [0], [0], [1], [0, 0, 1, 1], [], []>} : vector<1x32xbf16>, vector<32x33xbf16>, vector<1x33xf32> -> vector<1x33xf32>
    %224 = arith.addf %214, %223 : vector<1x33xf32>
    %c0_127 = arith.constant 0 : index
    %c0_128 = arith.constant 0 : index
    %c0_129 = arith.constant 0 : index
    %225 = vector.load %arg20[%c0_127, %c0_128, %c0_129] : memref<1x1x33xf32, #tpu.memory_space<vmem>>, vector<1x1x33xf32>
    %226 = vector.shape_cast %225 : vector<1x1x33xf32> to vector<1x33xf32>
    %227 = vector.shape_cast %224 : vector<1x33xf32> to vector<1x1x33xf32>
    tpu.vector_store %arg20[%c0_127, %c0_128, %c0_129], %227 {strides = array<i32>} : memref<1x1x33xf32, #tpu.memory_space<vmem>>, vector<1x1x33xf32>,
    return
  }
  func.func @transform_0(%arg0: i32) -> (i32, i32, i32) {
    %c0_i32 = arith.constant 0 : i32
    %c0_i32_0 = arith.constant 0 : i32
    %c0_i32_1 = arith.constant 0 : i32
    return %arg0, %c0_i32, %c0_i32_0 : i32, i32, i32
  }
  func.func @transform_1(%arg0: i32) -> (i32, i32, i32) {
    %c0_i32 = arith.constant 0 : i32
    %c0_i32_0 = arith.constant 0 : i32
    %c0_i32_1 = arith.constant 0 : i32
    %c0_i32_2 = arith.constant 0 : i32
    return %c0_i32, %c0_i32_0, %c0_i32_1 : i32, i32, i32
  }
  func.func @transform_2(%arg0: i32) -> (i32, i32) {
    %c0_i32 = arith.constant 0 : i32
    %c0_i32_0 = arith.constant 0 : i32
    %c0_i32_1 = arith.constant 0 : i32
    return %c0_i32, %c0_i32_0 : i32, i32
  }
  func.func @transform_3(%arg0: i32) -> (i32, i32, i32) {
    %c0_i32 = arith.constant 0 : i32
    %c0_i32_0 = arith.constant 0 : i32
    %c0_i32_1 = arith.constant 0 : i32
    %c0_i32_2 = arith.constant 0 : i32
    return %c0_i32, %c0_i32_0, %c0_i32_1 : i32, i32, i32
  }
  func.func @transform_4(%arg0: i32) -> (i32, i32) {
    %c0_i32 = arith.constant 0 : i32
    %c0_i32_0 = arith.constant 0 : i32
    %c0_i32_1 = arith.constant 0 : i32
    return %c0_i32, %c0_i32_0 : i32, i32
  }
  func.func @transform_5(%arg0: i32) -> (i32, i32) {
    %c0_i32 = arith.constant 0 : i32
    %c0_i32_0 = arith.constant 0 : i32
    %c0_i32_1 = arith.constant 0 : i32
    return %c0_i32, %c0_i32_0 : i32, i32
  }
  func.func @transform_6(%arg0: i32) -> (i32, i32) {
    %c0_i32 = arith.constant 0 : i32
    %c0_i32_0 = arith.constant 0 : i32
    %c0_i32_1 = arith.constant 0 : i32
    return %c0_i32, %c0_i32_0 : i32, i32
  }
  func.func @transform_7(%arg0: i32) -> (i32, i32, i32) {
    %c0_i32 = arith.constant 0 : i32
    %c0_i32_0 = arith.constant 0 : i32
    %c0_i32_1 = arith.constant 0 : i32
    %c0_i32_2 = arith.constant 0 : i32
    return %c0_i32, %c0_i32_0, %c0_i32_1 : i32, i32, i32
  }
  func.func @transform_8(%arg0: i32) -> (i32, i32) {
    %c0_i32 = arith.constant 0 : i32
    %c0_i32_0 = arith.constant 0 : i32
    %c0_i32_1 = arith.constant 0 : i32
    return %c0_i32, %c0_i32_0 : i32, i32
  }
  func.func @transform_9(%arg0: i32) -> (i32, i32, i32) {
    %c0_i32 = arith.constant 0 : i32
    %c0_i32_0 = arith.constant 0 : i32
    %c0_i32_1 = arith.constant 0 : i32
    %c0_i32_2 = arith.constant 0 : i32
    return %c0_i32, %c0_i32_0, %c0_i32_1 : i32, i32, i32
  }
  func.func @transform_10(%arg0: i32) -> (i32, i32) {
    %c0_i32 = arith.constant 0 : i32
    %c0_i32_0 = arith.constant 0 : i32
    %c0_i32_1 = arith.constant 0 : i32
    return %c0_i32, %c0_i32_0 : i32, i32
  }
  func.func @transform_11(%arg0: i32) -> (i32, i32) {
    %c0_i32 = arith.constant 0 : i32
    %c0_i32_0 = arith.constant 0 : i32
    %c0_i32_1 = arith.constant 0 : i32
    return %c0_i32, %c0_i32_0 : i32, i32
  }
  func.func @transform_12(%arg0: i32) -> (i32, i32) {
    %c0_i32 = arith.constant 0 : i32
    %c0_i32_0 = arith.constant 0 : i32
    %c0_i32_1 = arith.constant 0 : i32
    return %c0_i32, %c0_i32_0 : i32, i32
  }
  func.func @transform_13(%arg0: i32) -> (i32, i32, i32) {
    %c0_i32 = arith.constant 0 : i32
    %c0_i32_0 = arith.constant 0 : i32
    %c0_i32_1 = arith.constant 0 : i32
    %c0_i32_2 = arith.constant 0 : i32
    return %c0_i32, %c0_i32_0, %c0_i32_1 : i32, i32, i32
  }
  func.func @transform_14(%arg0: i32) -> (i32, i32) {
    %c0_i32 = arith.constant 0 : i32
    %c0_i32_0 = arith.constant 0 : i32
    %c0_i32_1 = arith.constant 0 : i32
    return %c0_i32, %c0_i32_0 : i32, i32
  }
  func.func @transform_15(%arg0: i32) -> (i32, i32, i32) {
    %c0_i32 = arith.constant 0 : i32
    %c0_i32_0 = arith.constant 0 : i32
    %c0_i32_1 = arith.constant 0 : i32
    %c0_i32_2 = arith.constant 0 : i32
    return %c0_i32, %c0_i32_0, %c0_i32_1 : i32, i32, i32
  }
  func.func @transform_16(%arg0: i32) -> (i32, i32) {
    %c0_i32 = arith.constant 0 : i32
    %c0_i32_0 = arith.constant 0 : i32
    %c0_i32_1 = arith.constant 0 : i32
    return %c0_i32, %c0_i32_0 : i32, i32
  }
  func.func @transform_17(%arg0: i32) -> (i32, i32, i32) {
    %c0_i32 = arith.constant 0 : i32
    %c0_i32_0 = arith.constant 0 : i32
    %c0_i32_1 = arith.constant 0 : i32
    %c0_i32_2 = arith.constant 0 : i32
    return %c0_i32, %c0_i32_0, %c0_i32_1 : i32, i32, i32
  }
  func.func @transform_18(%arg0: i32) -> (i32, i32) {
    %c0_i32 = arith.constant 0 : i32
    %c0_i32_0 = arith.constant 0 : i32
    %c0_i32_1 = arith.constant 0 : i32
    return %c0_i32, %c0_i32_0 : i32, i32
  }
  func.func @transform_19(%arg0: i32) -> (i32, i32, i32) {
    %c0_i32 = arith.constant 0 : i32
    %c0_i32_0 = arith.constant 0 : i32
    %c0_i32_1 = arith.constant 0 : i32
    return %arg0, %c0_i32, %c0_i32_0 : i32, i32, i32
  }
}

</mosaic_0001>

<bundles_post_ra>
// kernel: _lambda_.1
= control target key start
LH: loop header
LB: loop body
LE: loop exit
PB: predicated region body
PF: predicated region fallthrough
CT: control target
= control target key end

     0   :  { %s4350_s0 = inlined_call_operand.vmem [shape: f32[2,32,1], index: 0, kind: input, shape index: {}]   ;;  %s4351_s1 = inlined_call_operand.vmem [shape: bf16[2,1,16], index: 1, kind: input, shape index: {}]   ;;  %s4352_s2 = inlined_call_operand.vmem [shape: f32[1,16], index: 2, kind: input, shape index: {}]   ;;  %s4353_s3 = inlined_call_operand.hbm [shape: bf16[2,16,16], index: 3, kind: input, shape index: {}]   ;;  %s4354_s4 = inlined_call_operand.hbm [shape: f32[1,16], index: 4, kind: input, shape index: {}]   ;;  %s4355_s5 = inlined_call_operand.vmem [shape: bf16[1,16], index: 5, kind: input, shape index: {}]   ;;  %s4356_s6 = inlined_call_operand.hbm [shape: f32[1,16], index: 6, kind: input, shape index: {}]   ;;  %s4357_s7 = inlined_call_operand.hbm [shape: bf16[2,16,32], index: 7, kind: input, shape index: {}]   ;;  %s4358_s8 = inlined_call_operand.hbm [shape: f32[1,32], index: 8, kind: input, shape index: {}]   ;;  %s4359_s9 = inlined_call_operand.hbm [shape: bf16[2,32,32], index: 9, kind: input, shape index: {}]   ;;  %s4360_s10 = inlined_call_operand.hbm [shape: f32[1,32], index: 10, kind: input, shape index: {}]   ;;  %s4361_s11 = inlined_call_operand.hbm [shape: bf16[16,32], index: 11, kind: input, shape index: {}]   ;;  %s4362_s12 = inlined_call_operand.hbm [shape: f32[1,32], index: 12, kind: input, shape index: {}]   ;;  %s4363_s13 = inlined_call_operand.hbm [shape: bf16[2,32,32], index: 13, kind: input, shape index: {}]   ;;  %s4364_s14 = inlined_call_operand.hbm [shape: f32[1,32], index: 14, kind: input, shape index: {}]   ;;  %s4365_s15 = inlined_call_operand.vmem [shape: bf16[2,32,32], index: 15, kind: input, shape index: {}]   ;;  %s4366_s16 = inlined_call_operand.hbm [shape: f32[1,32], index: 16, kind: input, shape index: {}]   ;;  %s4367_s17 = inlined_call_operand.vmem [shape: bf16[8,32,33], index: 17, kind: input, shape index: {}]   ;;  %s4368_s18 = inlined_call_operand.hbm [shape: f32[1,33], index: 18, kind: input, shape index: {}]   ;;  %s4369_s19 = inlined_call_operand.hbm [shape: f32[2,1,33], index: 19, kind: output, shape index: {}]  }
   0x1   :  { %4386 = sst [smem:[#allocation46_spill]] %s4350_s0 }
   0x2   :  { %4387 = sst [smem:[#allocation47_spill]] %s4351_s1 }
   0x3   :  { %4388 = sst [smem:[#allocation48_spill]] %s4352_s2 }
   0x4   :  { %4389 = sst [smem:[#allocation49_spill]] %s4353_s3 }
   0x5   :  { %4390 = sst [smem:[#allocation50_spill]] %s4354_s4 }
   0x6   :  { %4391 = sst [smem:[#allocation51_spill]] %s4357_s7 }
   0x7   :  { %4392 = sst [smem:[#allocation52_spill]] %s4359_s9 }
   0x8   :  { %4393 = sst [smem:[#allocation53_spill]] %s4367_s17 }
   0x9   :  { %4394 = sst [smem:[#allocation54_spill]] %s4369_s19 }
   0xa   :  { %24 = vsyncpa [#allocation9], 0 }
   0xb   :  { %25 = vsyncpa [#allocation12], 0 }
   0xc   :  { %26 = vsyncpa [#allocation15], 0 }
   0xd   :  { %27 = vsyncpa [#allocation18], 0 }
   0xe   :  { %28 = vsyncpa [#allocation21], 0 }
   0xf   :  { %29 = vsyncpa [#allocation24], 0 }
  0x10   :  { %30 = vsyncpa [#allocation27], 0 }
  0x11   :  { %31 = vsyncpa [#allocation10], 0 }
  0x12   :  { %33 = vsyncpa [#allocation10 + $0x1], 0  ;;  %s3728_s0 = smov 0   ;;  %s3730_s30 = smov 0  }
  0x13   :  { %s3732_s20 = smov 0   ;;  %s3734_s21 = smov 0  }
  0x14 LB: > { %4395 = sst [smem:[#allocation38_spill]] %s3595_s0  ;;  %s3749_s1 = sadd.s32 4294967295, %s3607_s21   ;;  %s3607_s21 = sphi %s3734_s21, %s4441_s21   ;;  %s3603_s20 = sphi %s3732_s20, %s4444_s20   ;;  %s3599_s30 = sphi %s3730_s30, %s4443_s30   ;;  %s3595_s0 = sphi %s3728_s0, %s4442_s0  }
  0x15   : > { %4396 = sst [smem:[#allocation39_spill]] %s3599_s30  ;;  %s2562_s22 = sadd.s32 4294967294, %s3607_s21  }
  0x16   : > { %4397 = sst [smem:[#allocation40_spill]] %s3603_s20  ;;  %s3753_s2 = sadd.s32 1, %s3607_s21  }
  0x17   : > { %4398 = sst [smem:[#allocation41_spill]] %s3607_s21  ;;  %s450_s23 = sadd.s32 1, %s3603_s20 }
  0x18   : > { %4399 = sst [smem:[#allocation42_spill]] %s3753_s2  ;;  %s447_s24 = ssub.s32 %s3607_s21, %s3753_s2 }
  0x19   : > { %p460_p0 = scmp.ne.s32.totalorder %s3603_s20, %s3599_s30  ;;  %p448_p1 = scmp.eq.s32.totalorder %s447_s24, 0 }
  0x1a   : > { %p461_p2 = scmp.eq.s32.totalorder %s3749_s1, 1  ;;  %p466_p3 = scmp.ne.s32.totalorder %s3599_s30, %s3595_s0 }
  0x1b   : > { %p467_p4 = scmp.eq.s32.totalorder %s2562_s22, 1  ;;  %p2563_p7 = scmp.ge.s32.totalorder %s3607_s21, 1 }
  0x1c   : > { %s3764_s25 = scalar_select %p448_p1, %s3603_s20, %s450_s23  }
  0x1d   : > { %p3766_p5 = por %p461_p2, %p460_p0  ;;  %p3770_p6 = por %p467_p4, %p466_p3 }
  0x1e   : > { %4400 = sst [smem:[#allocation43_spill]] %s3764_s25  ;;  %p474_p8 = scmp.lt.s32.totalorder %s3607_s21, 3 }
  0x1f   : > { %s4401_s3 = scalar_select %p3766_p5, 1, 0 }
  0x20   : > { %s4403_s26 = scalar_select %p3770_p6, 1, 0 }
  0x21   : > { %4402 = sst [smem:[#allocation44_spill]] %s4401_s3  ;;  %p4379_p9 = scmp.eq.s32.totalorder %s3749_s1, 0 }
  0x22   : > { %4404 = sst [smem:[#allocation45_spill]] %s4403_s26  ;;  %p3777_p10 = pnand %p2563_p7, %p474_p8 }
  0x23   : > { %s3609_s28 = smov [#allocation11]   ;;  %s3610_s23 = smov [#allocation14]  }
  0x24   : > { %s4405_s27 = scalar_select %p3777_p10, 1, 0 }
  0x25   : > { %s506_s29 = sshll.u32 %s3609_s28, 4  ;;  %p2997_p11 = pneg %p3777_p10  ;;  %s507_s29 = int_to_ptr.vmem [resolvable:$true] %s506_s29 }
  0x26   : > { %s530_s24 = sshll.u32 %s3610_s23, 4  ;;  %s3611_s25 = smov [#allocation17]   ;;  %s3789_s24 = int_to_ptr.vmem [resolvable:$true] %s530_s24 }
  0x27   : > { %p3785_p12 = pnand %p4379_p9, %p2997_p11  ;;  %s3791_s20 = sshll.u32 %s3611_s25, 4  ;;  %s555_s20 = int_to_ptr.vmem [resolvable:$true] %s3791_s20 }
  0x28   : > { %s4407_s4 = sld [smem:[#allocation50_spill]] }
  0x29   : > { %p3801_p0 = pneg %p3785_p12 }
  0x2e   : > { %s3153_s28 = scalar_lea.hbm %s4407_s4, 16 }
  0x2f   : > { %p3154_p13 = scmp.ne.s32.totalorder %s4407_s4, %s3153_s28  ;;  %p3160_p3 = scmp.lt.u32.totalorder %s3153_s28, %s4407_s4 }
  0x31   : > { %p3156_p1 = pnand %p3801_p0, %p3154_p13 }
  0x33   : > { %p3157_p2 = pneg %p3156_p1 }
  0x35   : > { %p3162_p4 = pnand %p3160_p3, %p3157_p2 }
  0x37   : > { %3165 = shalt.err (!%p3162_p4)
}
  0x38   : > { %s3166_s2 = scalar_lea.vmem %s507_s29, 16  ;;  %s3173_s0 = scalar_lea.vmem %s507_s29, 32 }
  0x39   : > { %p3167_p7 = scmp.ne.s32.totalorder %s507_s29, %s3166_s2  ;;  %p3174_p9 = scmp.lt.s32.totalorder %s507_s29, %s507_s29 }
  0x3a   : > { %p3175_p6 = scmp.lt.s32.totalorder %s3173_s0, %s3166_s2 }
  0x3b   : > { %p3169_p8 = pnand %p3167_p7, %p3801_p0 }
  0x3c   : > { %p3176_p5 = por %p3175_p6, %p3174_p9 }
  0x3d   : > { %p3170_p11 = pneg %p3169_p8 }
  0x3f   : > { %p3177_p10 = pnand %p3176_p5, %p3170_p11 }
  0x41   : > { %3180 = shalt.err (!%p3177_p10)
}
  0x42   : > { %3003 = dma.hbm_to_vmem [thread:$0]  (!%p3785_p12), %s4407_s4, 16, %s507_s29, [#allocation12]  }
  0x43   : > { %s4409_s7 = sld [smem:[#allocation51_spill]] }
  0x49   : > { %s3181_s25 = scalar_lea.hbm %s4409_s7, 256 }
  0x4a   : > { %p3182_p13 = scmp.ne.s32.totalorder %s4409_s7, %s3181_s25  ;;  %p3188_p5 = scmp.lt.u32.totalorder %s3181_s25, %s4409_s7 }
  0x4c   : > { %p3184_p1 = pnand %p3182_p13, %p3801_p0 }
  0x4e   : > { %p3185_p6 = pneg %p3184_p1 }
  0x50   : > { %p3190_p9 = pnand %p3188_p5, %p3185_p6 }
  0x52   : > { %3193 = shalt.err (!%p3190_p9)
}
  0x53   : > { %s3194_s29 = scalar_lea.vmem %s3789_s24, 256  ;;  %p3202_p4 = scmp.lt.s32.totalorder %s3789_s24, %s3789_s24 }
  0x54   : > { %p3195_p10 = scmp.ne.s32.totalorder %s3789_s24, %s3194_s29  ;;  %p3203_p7 = scmp.lt.s32.totalorder %s3194_s29, %s3194_s29 }
  0x56   : > { %p3197_p2 = pnand %p3195_p10, %p3801_p0  ;;  %p3204_p8 = por %p3203_p7, %p3202_p4 }
  0x58   : > { %p3198_p3 = pneg %p3197_p2 }
  0x5a   : > { %p3205_p11 = pnand %p3204_p8, %p3198_p3 }
  0x5c   : > { %3208 = shalt.err (!%p3205_p11)
}
  0x5d   : > { %s3612_s30 = smov 64   ;;  %s3613_s3 = smov 4  }
  0x5e   : > { %3009 = dma.hbm_to_vmem [thread:$0]  (!%p3785_p12), %s4409_s7, 256, %s3789_s24, [#allocation15], %s3612_s30, %s3612_s30, %s3613_s3  }
  0x5f   : > { %s4410_s9 = sld [smem:[#allocation52_spill]] }
  0x65   : > { %s3209_s25 = scalar_lea.hbm %s4410_s9, 512 }
  0x66   : > { %p3210_p13 = scmp.ne.s32.totalorder %s4410_s9, %s3209_s25  ;;  %p3216_p5 = scmp.lt.u32.totalorder %s3209_s25, %s4410_s9 }
  0x68   : > { %p3212_p1 = pnand %p3210_p13, %p3801_p0 }
  0x6a   : > { %p3213_p6 = pneg %p3212_p1 }
  0x6c   : > { %p3218_p9 = pnand %p3216_p5, %p3213_p6 }
  0x6e   : > { %3221 = shalt.err (!%p3218_p9)
}
  0x6f   : > { %s3222_s21 = scalar_lea.vmem %s555_s20, 512  ;;  %p3230_p4 = scmp.lt.s32.totalorder %s555_s20, %s555_s20 }
  0x70   : > { %p3223_p10 = scmp.ne.s32.totalorder %s555_s20, %s3222_s21  ;;  %p3231_p7 = scmp.lt.s32.totalorder %s3222_s21, %s3222_s21 }
  0x72   : > { %p3225_p2 = pnand %p3223_p10, %p3801_p0  ;;  %p3232_p8 = por %p3231_p7, %p3230_p4 }
  0x74   : > { %p3226_p3 = pneg %p3225_p2 }
  0x76   : > { %p3233_p11 = pnand %p3232_p8, %p3226_p3 }
  0x78   : > { %3236 = shalt.err (!%p3233_p11)
}
  0x79   : > { %3015 = dma.hbm_to_vmem [thread:$0]  (!%p3785_p12), %s4410_s9, 512, %s555_s20, [#allocation18], %s3612_s30, %s3612_s30, %s3613_s3  }
  0x7a   : > { %s3614_s26 = smov [#allocation20]   ;;  %s3615_s23 = smov [#allocation23]  }
  0x7b   : > { %s578_s28 = sshll.u32 %s3614_s26, 4  ;;  %s602_s25 = sshll.u32 %s3615_s23, 4  ;;  %s579_s28 = int_to_ptr.vmem [resolvable:$true] %s578_s28  ;;  %s603_s25 = int_to_ptr.vmem [resolvable:$true] %s602_s25 }
  0x7c   : > { %s3237_s29 = scalar_lea.hbm %s4361_s11, 128 }
  0x7d   : > { %p3238_p13 = scmp.ne.s32.totalorder %s4361_s11, %s3237_s29  ;;  %p3244_p5 = scmp.lt.u32.totalorder %s3237_s29, %s4361_s11 }
  0x7f   : > { %p3240_p1 = pnand %p3238_p13, %p3801_p0 }
  0x81   : > { %p3241_p6 = pneg %p3240_p1 }
  0x83   : > { %p3246_p9 = pnand %p3244_p5, %p3241_p6 }
  0x85   : > { %3249 = shalt.err (!%p3246_p9)
}
  0x86   : > { %s3250_s20 = scalar_lea.vmem %s579_s28, 128  ;;  %p3258_p4 = scmp.lt.s32.totalorder %s579_s28, %s579_s28 }
  0x87   : > { %p3251_p10 = scmp.ne.s32.totalorder %s579_s28, %s3250_s20  ;;  %p3259_p7 = scmp.lt.s32.totalorder %s3250_s20, %s3250_s20 }
  0x89   : > { %p3253_p2 = pnand %p3251_p10, %p3801_p0  ;;  %p3260_p8 = por %p3259_p7, %p3258_p4 }
  0x8b   : > { %p3254_p3 = pneg %p3253_p2 }
  0x8d   : > { %p3261_p11 = pnand %p3260_p8, %p3254_p3 }
  0x8f   : > { %3264 = shalt.err (!%p3261_p11)
}
  0x90   : > { %3021 = dma.hbm_to_vmem [thread:$0]  (!%p3785_p12), %s4361_s11, 128, %s579_s28, [#allocation21], %s3612_s30, %s3612_s30, %s3613_s3  }
  0x91   : > { %s3265_s23 = scalar_lea.hbm %s4363_s13, 512 }
  0x92   : > { %p3266_p13 = scmp.ne.s32.totalorder %s4363_s13, %s3265_s23  ;;  %p3272_p5 = scmp.lt.u32.totalorder %s3265_s23, %s4363_s13 }
  0x94   : > { %p3268_p1 = pnand %p3266_p13, %p3801_p0 }
  0x96   : > { %p3269_p6 = pneg %p3268_p1 }
  0x98   : > { %p3274_p9 = pnand %p3272_p5, %p3269_p6 }
  0x9a   : > { %3277 = shalt.err (!%p3274_p9)
}
  0x9b   : > { %s3278_s4 = scalar_lea.vmem %s603_s25, 512  ;;  %p3286_p4 = scmp.lt.s32.totalorder %s603_s25, %s603_s25 }
  0x9c   : > { %p3279_p10 = scmp.ne.s32.totalorder %s603_s25, %s3278_s4  ;;  %p3287_p7 = scmp.lt.s32.totalorder %s3278_s4, %s3278_s4 }
  0x9e   : > { %p3281_p2 = pnand %p3279_p10, %p3801_p0  ;;  %p3288_p8 = por %p3287_p7, %p3286_p4 }
  0xa0   : > { %p3282_p3 = pneg %p3281_p2 }
  0xa2   : > { %p3289_p11 = pnand %p3288_p8, %p3282_p3 }
  0xa4   : > { %3292 = shalt.err (!%p3289_p11)
}
  0xa5   : > { %3027 = dma.hbm_to_vmem [thread:$0]  (!%p3785_p12), %s4363_s13, 512, %s603_s25, [#allocation24], %s3612_s30, %s3612_s30, %s3613_s3  }
  0xa6   : > { %s3616_s7 = smov [#allocation26]   ;;  %s3617_s24 = smov [#allocation8]  }
  0xa7   : > { %s630_s17 = sshll.u32 %s3616_s7, 4  ;;  %s492_s26 = sshll.u32 %s3617_s24, 4  ;;  %s631_s17 = int_to_ptr.vmem [resolvable:$true] %s630_s17  ;;  %s493_s26 = int_to_ptr.vmem [resolvable:$true] %s492_s26 }
  0xa8   : > { %s3293_s0 = scalar_lea.hbm %s4366_s16, 16 }
  0xa9   : > { %p3294_p13 = scmp.ne.s32.totalorder %s4366_s16, %s3293_s0  ;;  %p3300_p5 = scmp.lt.u32.totalorder %s3293_s0, %s4366_s16 }
  0xab   : > { %p3296_p1 = pnand %p3294_p13, %p3801_p0 }
  0xad   : > { %p3297_p6 = pneg %p3296_p1 }
  0xaf   : > { %p3302_p9 = pnand %p3300_p5, %p3297_p6 }
  0xb1   : > { %3305 = shalt.err (!%p3302_p9)
}
  0xb2   : > { %s3306_s25 = scalar_lea.vmem %s631_s17, 16  ;;  %s3313_s20 = scalar_lea.vmem %s631_s17, 32 }
  0xb3   : > { %p3307_p10 = scmp.ne.s32.totalorder %s631_s17, %s3306_s25  ;;  %p3314_p4 = scmp.lt.s32.totalorder %s631_s17, %s631_s17 }
  0xb4   : > { %p3315_p7 = scmp.lt.s32.totalorder %s3313_s20, %s3306_s25 }
  0xb5   : > { %p3309_p2 = pnand %p3307_p10, %p3801_p0 }
  0xb6   : > { %p3316_p8 = por %p3315_p7, %p3314_p4 }
  0xb7   : > { %p3310_p3 = pneg %p3309_p2 }
  0xb9   : > { %p3317_p11 = pnand %p3316_p8, %p3310_p3 }
  0xbb   : > { %3320 = shalt.err (!%p3317_p11)
}
  0xbc   : > { %3033 = dma.hbm_to_vmem [thread:$0]  (!%p3785_p12), %s4366_s16, 16, %s631_s17, [#allocation27]  }
  0xbd   : > { %s4411_s0 = sld [smem:[#allocation49_spill]] }
  0xc3   : > { %s4412_s29 = smov %s4411_s0  ;;  %s3321_s21 = scalar_lea.hbm %s4411_s0, 256 }
  0xc4   : > { %p3322_p13 = scmp.ne.s32.totalorder %s4412_s29, %s3321_s21  ;;  %p3328_p5 = scmp.lt.u32.totalorder %s3321_s21, %s4412_s29 }
  0xc6   : > { %p3324_p1 = pnand %p3322_p13, %p3801_p0 }
  0xc8   : > { %p3325_p6 = pneg %p3324_p1 }
  0xca   : > { %p3330_p9 = pnand %p3328_p5, %p3325_p6 }
  0xcc   : > { %3333 = shalt.err (!%p3330_p9)
}
  0xcd   : > { %s3334_s7 = scalar_lea.vmem %s493_s26, 256  ;;  %p3342_p4 = scmp.lt.s32.totalorder %s493_s26, %s493_s26 }
  0xce   : > { %p3335_p10 = scmp.ne.s32.totalorder %s493_s26, %s3334_s7  ;;  %p3343_p7 = scmp.lt.s32.totalorder %s3334_s7, %s3334_s7 }
  0xd0   : > { %p3337_p2 = pnand %p3335_p10, %p3801_p0  ;;  %p3344_p8 = por %p3343_p7, %p3342_p4 }
  0xd2   : > { %p3338_p3 = pneg %p3337_p2 }
  0xd4   : > { %p3345_p11 = pnand %p3344_p8, %p3338_p3 }
  0xd6   : > { %3348 = shalt.err (!%p3345_p11)
}
  0xd7   : > { %3000 = dma.hbm_to_vmem [thread:$0]  (!%p3785_p12), %s4412_s29, 256, %s493_s26, [#allocation9], %s3612_s30, %s3612_s30, %s3613_s3  }
  0xd8   : > { %s3618_s23 = smov [#allocation13]   ;;  %s3619_s0 = smov [#allocation16]  }
  0xd9   : > { %s520_s2 = sshll.u32 %s3618_s23, 4  ;;  %s544_s21 = sshll.u32 %s3619_s0, 4  ;;  %s521_s2 = int_to_ptr.vmem [resolvable:$true] %s520_s2  ;;  %s545_s21 = int_to_ptr.vmem [resolvable:$true] %s544_s21 }
  0xda   : > { %s3349_s25 = scalar_lea.hbm %s4356_s6, 16 }
  0xdb   : > { %p3350_p13 = scmp.ne.s32.totalorder %s4356_s6, %s3349_s25  ;;  %p3356_p5 = scmp.lt.u32.totalorder %s3349_s25, %s4356_s6 }
  0xdd   : > { %p3352_p1 = pnand %p3350_p13, %p3801_p0 }
  0xdf   : > { %p3353_p6 = pneg %p3352_p1 }
  0xe1   : > { %p3358_p9 = pnand %p3356_p5, %p3353_p6 }
  0xe3   : > { %3361 = shalt.err (!%p3358_p9)
}
  0xe4   : > { %s3362_s30 = scalar_lea.vmem %s521_s2, 16  ;;  %s3369_s3 = scalar_lea.vmem %s521_s2, 32 }
  0xe5   : > { %p3363_p10 = scmp.ne.s32.totalorder %s521_s2, %s3362_s30  ;;  %p3370_p4 = scmp.lt.s32.totalorder %s521_s2, %s521_s2 }
  0xe6   : > { %p3371_p7 = scmp.lt.s32.totalorder %s3369_s3, %s3362_s30 }
  0xe7   : > { %p3365_p2 = pnand %p3363_p10, %p3801_p0 }
  0xe8   : > { %p3372_p8 = por %p3371_p7, %p3370_p4 }
  0xe9   : > { %p3366_p3 = pneg %p3365_p2 }
  0xeb   : > { %p3373_p11 = pnand %p3372_p8, %p3366_p3 }
  0xed   : > { %3376 = shalt.err (!%p3373_p11)
}
  0xee   : > { %3006 = dma.hbm_to_vmem [thread:$0]  (!%p3785_p12), %s4356_s6, 16, %s521_s2, [#allocation12]  }
  0xef   : > { %s3377_s0 = scalar_lea.hbm %s4358_s8, 16 }
  0xf0   : > { %p3378_p13 = scmp.ne.s32.totalorder %s4358_s8, %s3377_s0  ;;  %p3384_p5 = scmp.lt.u32.totalorder %s3377_s0, %s4358_s8 }
  0xf2   : > { %p3380_p1 = pnand %p3378_p13, %p3801_p0 }
  0xf4   : > { %p3381_p6 = pneg %p3380_p1 }
  0xf6   : > { %p3386_p9 = pnand %p3384_p5, %p3381_p6 }
  0xf8   : > { %3389 = shalt.err (!%p3386_p9)
}
  0xf9   : > { %s3390_s7 = scalar_lea.vmem %s545_s21, 16  ;;  %s3397_s2 = scalar_lea.vmem %s545_s21, 32 }
  0xfa   : > { %p3391_p10 = scmp.ne.s32.totalorder %s545_s21, %s3390_s7  ;;  %p3398_p4 = scmp.lt.s32.totalorder %s545_s21, %s545_s21 }
  0xfb   : > { %p3399_p7 = scmp.lt.s32.totalorder %s3397_s2, %s3390_s7 }
  0xfc   : > { %p3393_p2 = pnand %p3391_p10, %p3801_p0 }
  0xfd   : > { %p3400_p8 = por %p3399_p7, %p3398_p4 }
  0xfe   : > { %p3394_p3 = pneg %p3393_p2 }
 0x100   : > { %p3401_p11 = pnand %p3400_p8, %p3394_p3 }
 0x102   : > { %3404 = shalt.err (!%p3401_p11)
}
 0x103   : > { %3012 = dma.hbm_to_vmem [thread:$0]  (!%p3785_p12), %s4358_s8, 16, %s545_s21, [#allocation15]  }
 0x104   : > { %s3620_s3 = smov [#allocation19]   ;;  %s3621_s24 = smov [#allocation22]  }
 0x105   : > { %s568_s26 = sshll.u32 %s3620_s3, 4  ;;  %s592_s9 = sshll.u32 %s3621_s24, 4  ;;  %s569_s26 = int_to_ptr.vmem [resolvable:$true] %s568_s26  ;;  %s593_s9 = int_to_ptr.vmem [resolvable:$true] %s592_s9 }
 0x106   : > { %s3405_s4 = scalar_lea.hbm %s4360_s10, 16 }
 0x107   : > { %p3406_p13 = scmp.ne.s32.totalorder %s4360_s10, %s3405_s4  ;;  %p3412_p5 = scmp.lt.u32.totalorder %s3405_s4, %s4360_s10 }
 0x109   : > { %p3408_p1 = pnand %p3406_p13, %p3801_p0 }
 0x10b   : > { %p3409_p6 = pneg %p3408_p1 }
 0x10d   : > { %p3414_p9 = pnand %p3412_p5, %p3409_p6 }
 0x10f   : > { %3417 = shalt.err (!%p3414_p9)
}
 0x110   : > { %s3418_s21 = scalar_lea.vmem %s569_s26, 16  ;;  %s3425_s2 = scalar_lea.vmem %s569_s26, 32 }
 0x111   : > { %p3419_p10 = scmp.ne.s32.totalorder %s569_s26, %s3418_s21  ;;  %p3426_p4 = scmp.lt.s32.totalorder %s569_s26, %s569_s26 }
 0x112   : > { %p3427_p7 = scmp.lt.s32.totalorder %s3425_s2, %s3418_s21 }
 0x113   : > { %p3421_p2 = pnand %p3419_p10, %p3801_p0 }
 0x114   : > { %p3428_p8 = por %p3427_p7, %p3426_p4 }
 0x115   : > { %p3422_p3 = pneg %p3421_p2 }
 0x117   : > { %p3429_p11 = pnand %p3428_p8, %p3422_p3 }
 0x119   : > { %3432 = shalt.err (!%p3429_p11)
}
 0x11a   : > { %3018 = dma.hbm_to_vmem [thread:$0]  (!%p3785_p12), %s4360_s10, 16, %s569_s26, [#allocation18]  }
 0x11b   : > { %s3433_s23 = scalar_lea.hbm %s4362_s12, 16 }
 0x11c   : > { %p3434_p13 = scmp.ne.s32.totalorder %s4362_s12, %s3433_s23  ;;  %p3440_p5 = scmp.lt.u32.totalorder %s3433_s23, %s4362_s12 }
 0x11e   : > { %p3436_p1 = pnand %p3434_p13, %p3801_p0 }
 0x120   : > { %p3437_p6 = pneg %p3436_p1 }
 0x122   : > { %p3442_p9 = pnand %p3440_p5, %p3437_p6 }
 0x124   : > { %3445 = shalt.err (!%p3442_p9)
}
 0x125   : > { %s3446_s20 = scalar_lea.vmem %s593_s9, 16  ;;  %s3453_s26 = scalar_lea.vmem %s593_s9, 32 }
 0x126   : > { %p3447_p10 = scmp.ne.s32.totalorder %s593_s9, %s3446_s20  ;;  %p3454_p4 = scmp.lt.s32.totalorder %s593_s9, %s593_s9 }
 0x127   : > { %p3455_p7 = scmp.lt.s32.totalorder %s3453_s26, %s3446_s20 }
 0x128   : > { %p3449_p2 = pnand %p3447_p10, %p3801_p0 }
 0x129   : > { %p3456_p8 = por %p3455_p7, %p3454_p4 }
 0x12a   : > { %p3450_p3 = pneg %p3449_p2 }
 0x12c   : > { %p3457_p11 = pnand %p3456_p8, %p3450_p3 }
 0x12e   : > { %3460 = shalt.err (!%p3457_p11)
}
 0x12f   : > { %3024 = dma.hbm_to_vmem [thread:$0]  (!%p3785_p12), %s4362_s12, 16, %s593_s9, [#allocation21]  }
 0x130   : > { %s3622_s2 = smov [#allocation25]   ;;  %s3623_s30 = smov [#allocation28]  }
 0x131   : > { %s616_s17 = sshll.u32 %s3622_s2, 4  ;;  %s644_s3 = sshll.u32 %s3623_s30, 4  ;;  %s617_s17 = int_to_ptr.vmem [resolvable:$true] %s616_s17  ;;  %s645_s3 = int_to_ptr.vmem [resolvable:$true] %s644_s3 }
 0x132   : > { %s3461_s0 = scalar_lea.hbm %s4364_s14, 16 }
 0x133   : > { %p3462_p13 = scmp.ne.s32.totalorder %s4364_s14, %s3461_s0  ;;  %p3468_p5 = scmp.lt.u32.totalorder %s3461_s0, %s4364_s14 }
 0x135   : > { %p3464_p1 = pnand %p3462_p13, %p3801_p0 }
 0x137   : > { %p3465_p6 = pneg %p3464_p1 }
 0x139   : > { %p3470_p9 = pnand %p3468_p5, %p3465_p6 }
 0x13b   : > { %3473 = shalt.err (!%p3470_p9)
}
 0x13c   : > { %s3474_s9 = scalar_lea.vmem %s617_s17, 16  ;;  %s3481_s26 = scalar_lea.vmem %s617_s17, 32 }
 0x13d   : > { %p3475_p10 = scmp.ne.s32.totalorder %s617_s17, %s3474_s9  ;;  %p3482_p4 = scmp.lt.s32.totalorder %s617_s17, %s617_s17 }
 0x13e   : > { %p3483_p7 = scmp.lt.s32.totalorder %s3481_s26, %s3474_s9 }
 0x13f   : > { %p3477_p2 = pnand %p3475_p10, %p3801_p0 }
 0x140   : > { %p3484_p8 = por %p3483_p7, %p3482_p4 }
 0x141   : > { %p3478_p3 = pneg %p3477_p2 }
 0x143   : > { %p3485_p11 = pnand %p3484_p8, %p3478_p3 }
 0x145   : > { %3488 = shalt.err (!%p3485_p11)
}
 0x146   : > { %3030 = dma.hbm_to_vmem [thread:$0]  (!%p3785_p12), %s4364_s14, 16, %s617_s17, [#allocation24]  }
 0x147   : > { %s3489_s24 = scalar_lea.hbm %s4368_s18, 16 }
 0x148   : > { %p3490_p13 = scmp.ne.s32.totalorder %s4368_s18, %s3489_s24  ;;  %p3496_p5 = scmp.lt.u32.totalorder %s3489_s24, %s4368_s18 }
 0x14a   : > { %p3492_p1 = pnand %p3490_p13, %p3801_p0 }
 0x14c   : > { %p3493_p6 = pneg %p3492_p1 }
 0x14e   : > { %p3498_p9 = pnand %p3496_p5, %p3493_p6 }
 0x150   : > { %3501 = shalt.err (!%p3498_p9)
}
 0x151   : > { %s3502_s25 = scalar_lea.vmem %s645_s3, 16  ;;  %s3509_s17 = scalar_lea.vmem %s645_s3, 32 }
 0x152   : > { %p3503_p10 = scmp.ne.s32.totalorder %s645_s3, %s3502_s25  ;;  %p3510_p4 = scmp.lt.s32.totalorder %s645_s3, %s645_s3 }
 0x153   : > { %p3511_p7 = scmp.lt.s32.totalorder %s3509_s17, %s3502_s25 }
 0x154   : > { %p3505_p2 = pnand %p3503_p10, %p3801_p0 }
 0x155   : > { %p3512_p8 = por %p3511_p7, %p3510_p4 }
 0x156   : > { %p3506_p3 = pneg %p3505_p2 }
 0x158   : > { %p3513_p11 = pnand %p3512_p8, %p3506_p3 }
 0x15a   : > { %3516 = shalt.err (!%p3513_p11)
}
 0x15b   : > { %3036 = dma.hbm_to_vmem [thread:$0]  (!%p3785_p12), %s4368_s18, 16, %s645_s3, [#allocation27]  }
 0x15c   : > { %p4413_p13 = scmp.ne.s32.totalorder %s4405_s27, 0 }
 0x15d   : > { %p4414_p1 = scmp.eq.s32.totalorder (!%p4413_p13), %s3749_s1, 0 }
 0x15e   : > { %665 = sbr.rel (%p4413_p13) target bundleno = 2037 (0x7f5), region = 96 }
 0x165   : > { %3562 = dma.done.wait (%p4414_p1), [#allocation9], 256   ;;  %p4415_p0 = pmov %p4414_p1 }
 0x167   : > { %3564 = vsyncadd (%p4415_p0), [#allocation9], 4294967040  ;;  %p4416_p6 = pmov %p4415_p0 }
 0x168   : > { %p4417_p5 = pmov %p4415_p0 }
 0x169   : > { %3566 = dma.done.wait (%p4416_p6), [#allocation12], 32  }
 0x16a   : > { %3568 = vsyncadd (%p4417_p5), [#allocation12], 4294967264  ;;  %p4418_p9 = pmov %p4415_p0 }
 0x16b   : > { %p4419_p12 = pmov %p4415_p0 }
 0x16c   : > { %3570 = dma.done.wait (%p4418_p9), [#allocation15], 272  }
 0x16d   : > { %3572 = vsyncadd (%p4419_p12), [#allocation15], 4294967024  ;;  %p4420_p10 = pmov %p4415_p0 }
 0x16e   : > { %p4421_p2 = pmov %p4415_p0 }
 0x16f   : > { %3574 = dma.done.wait (%p4420_p10), [#allocation18], 528  }
 0x170   : > { %3576 = vsyncadd (%p4421_p2), [#allocation18], 4294966768  ;;  %p4422_p3 = pmov %p4415_p0 }
 0x171   : > { %p4423_p4 = pmov %p4415_p0 }
 0x172   : > { %3578 = dma.done.wait (%p4422_p3), [#allocation21], 144  }
 0x173   : > { %3580 = vsyncadd (%p4423_p4), [#allocation21], 4294967152  ;;  %p4424_p7 = pmov %p4415_p0 }
 0x174   : > { %p4425_p8 = pmov %p4415_p0 }
 0x175   : > { %3582 = dma.done.wait (%p4424_p7), [#allocation24], 528  }
 0x176   : > { %3584 = vsyncadd (%p4425_p8), [#allocation24], 4294966768  ;;  %p4426_p11 = pmov %p4415_p0 }
 0x177   : > { %p4427_p13 = pmov %p4415_p0 }
 0x178   : > { %3586 = dma.done.wait (%p4426_p11), [#allocation27], 32  }
 0x179   : > { %3588 = vsyncadd (%p4427_p13), [#allocation27], 4294967264  ;;  %p768_p1 = scmp.lt.s32.totalorder %s3749_s1, 1  ;;  %vm856_vm0 = vcmask 0   ;;  %v3624_v0 = vmov 0   ;;  %v3625_v1 = vmov 0.0   ;;  %v884_v12 = vlaneseq }
 0x17a   : > { %3119 = vset.pattern.permute.xlu1 %v3624_v0  ;;  %3118 = vset.pattern.permute.xlu0 %v3624_v0  ;;  %857 = vst.msk [vmem:[#allocation2] sm:$0x1] %vm856_vm0, %v3625_v1  ;;  %s4428_s26 = sld [smem:[#allocation46_spill]]  ;;  %vm858_vm1 = vcmask 7168   ;;  %vm943_vm2 = vcmask 122880   ;;  %v3120_v10 = vld [vmem:[#allocation8 + $0x8] sm:$0xff]  }
 0x17b   : > { %s769_s19 = scalar_select %p768_p1, %s3749_s1, 1  ;;  %944 = vst.msk [vmem:[#allocation3] sm:$0x1] %vm943_vm2, %v3625_v1  ;;  %2732 = vmatprep.subr.bf16.mxu0 %v3120_v10  ;;  %v3121_v11 = vld [vmem:[#allocation8] sm:$0xff]   ;;  %v885_v13 = vshrl.u32 %v884_v12, 7  ;;  %vm945_vm3 = vcmask 130048  }
 0x17c   : > { %2733 = vmatpush3.bf16.msra.mxu0 %v3120_v10  ;;  %v782_v14 = vld [vmem:[%s4355_s5] sm:$0x1]  ;;  %s4429_s23 = sld [smem:[#allocation47_spill]]  ;;  %s4430_s17 = sld [smem:[#allocation48_spill]]  ;;  %vm1121_vm4 = vcmask 123904   ;;  %vm1271_vm5 = vcmask 254976  }
 0x17d   : > { %s2668_s27 = sshll.u32 %s769_s19, 5  ;;  %2738 = vmatprep.subr.bf16.mxu0 %v3121_v11  ;;  %v886_v15 = vsub.s32 0, %v885_v13  ;;  %v1094_v16 = vunpack.c.l.bf16 %v782_v14  ;;  %1122 = vst.msk [vmem:[#allocation4] sm:$0x3] %vm1121_vm4, %v3625_v1  ;;  %vm1273_vm6 = vcmask 261120   ;;  %vm1503_vm7 = vcmask 257024  }
 0x17e   : > { %1272 = vst.msk [vmem:[#allocation5] sm:$0x3] %vm1271_vm5, %v3625_v1  ;;  %s4431_s30 = sld [smem:[#allocation53_spill]]  ;;  %vm3626_vm8 = vmmov 0   ;;  %s4433_s3 = sld [smem:[#allocation39_spill]]  ;;  %vm2366_vm9 = vcmask 262144  }
 0x17f   : > { %v1098_v19 = vrot.slane %v1094_v16, %v886_v15  ;;  %1504 = vst.msk [vmem:[#allocation6] sm:$0xf] %vm1503_vm7, %v3625_v1  ;;  %1665 = vst.msk [vmem:[#allocation7] sm:$0xf] %vm1503_vm7, %v3625_v1  ;;  %s4434_s0 = sld [smem:[#allocation44_spill]]  ;;  %s2665_s4 = sshll.u32 %s3749_s1, 4 }
 0x180   : > { %s772_s7 = scalar_lea.vmem %s4428_s26, %s2668_s27  ;;  %s4435_s9 = sld [smem:[#allocation54_spill]] }
 0x181   : > { %v854_v2 = vld [vmem:[%s772_s7 + $0x10] sm:$0xff]  ;;  %v852_v3 = vld [vmem:[%s772_s7] sm:$0xff]  ;;  %v855_v4 = vld [vmem:[%s772_s7 + $0x18] sm:$0xff]  ;;  %s3627_s22 = smov [#allocation29]  }
 0x182   : > { %876 = vperm.xlu1 %3119, %v854_v2   ;;  %861 = vst.msk [vmem:[#allocation2 + $0x11] sm:$0xff] %vm858_vm1, %v854_v2  ;;  %866 = vperm.xlu0 %3118, %v852_v3   ;;  %859 = vst.msk [vmem:[#allocation2 + $0x1] sm:$0xff] %vm858_vm1, %v852_v3  ;;  %v853_v5 = vld [vmem:[%s772_s7 + $0x8] sm:$0xff]  ;;  %v775_v17 = vld [vmem:[%s4429_s23 + $0x1] sm:$0x1] }
 0x183   : > { %862 = vst.msk [vmem:[#allocation2 + $0x19] sm:$0xff] %vm858_vm1, %v855_v4  ;;  %860 = vst.msk [vmem:[#allocation2 + $0x9] sm:$0xff] %vm858_vm1, %v853_v5  ;;  %v863_v18 = vunpack.c.l.bf16 %v775_v17  ;;  %v774_v20 = vld [vmem:[%s4429_s23] sm:$0x1]  ;;  %v3122_v2 = vld [vmem:[#allocation14 + $0x8] sm:$0xff]  }
 0x184   : > { %v906_v26 = vunpack.c.l.bf16 %v774_v20  ;;  %v2594_v33 = vld [vmem:[%s4430_s17] ss:$0 sm:$0xff]  ;;  %v3123_v3 = vld [vmem:[#allocation20] sm:$0xff]   ;;  %s4432_s24 = smov %s4431_s30 }
 0x185   : > { %v887_v23 = vrot.slane %v863_v18, %v886_v15  ;;  %2772 = vmatprep.subr.bf16.mxu1 %v3123_v3  ;;  %p4436_p6 = scmp.ne.s32.totalorder %s4434_s0, 0 }
 0x186   : > { %881 = vperm.xlu1 %3119, %v855_v4   ;;  %871 = vperm.xlu0 %3118, %v853_v5   ;;  %v930_v32 = vrot.slane %v906_v26, %v886_v15  ;;  %v3124_v4 = vld [vmem:[#allocation14] sm:$0xff]   ;;  %v2595_v5 = vld [vmem:[#allocation11] ss:$0 sm:$0xff]  ;;  %s4308_s19 = scalar_lea.hbm %s4435_s9, %s2665_s4 }
 0x187   : > { %2773 = vmatpush3.bf16.msra.mxu1 %v3123_v3 }
 0x189   : > { %v902_v6 = vld [vmem:[#allocation2] sm:$0xff] }
 0x18a   : > { %v903_v7 = vld [vmem:[#allocation2 + $0x8] sm:$0xff]  ;;  %909 = vperm.xlu0 %3118, %v902_v6   ;;  %v905_v8 = vld [vmem:[#allocation2 + $0x18] sm:$0xff]  ;;  %v904_v9 = vld [vmem:[#allocation2 + $0x10] sm:$0xff] }
 0x18b   : > { %914 = vperm.xlu1 %3119, %v903_v7   ;;  %v2602_v6 = vld [vmem:[#allocation13] ss:$0 sm:$0xff] }
 0x18e   : > { %919 = vperm.xlu0 %3118, %v904_v9  }
 0x18f   : > { %924 = vperm.xlu1 %3119, %v905_v8  }
 0x201   : > { %v877_v21 = vpop.permute.xlu1 %876  ;;  %v867_v22 = vpop.permute.xlu0 %866 }
 0x202   : > { %v4100_v24 = vmul.f32 %v1098_v19, %v877_v21  ;;  %v4102_v25 = vmul.f32 %v1098_v19, %v867_v22  ;;  %v888_v29 = vmul.f32 %v887_v23, %v867_v22  ;;  %v890_v36 = vmul.f32 %v887_v23, %v877_v21 }
 0x204   : > { %v898_v37 = vadd.f32 %v2594_v33, %v888_v29  ;;  %v900_v46 = vadd.f32 %v2594_v33, %v890_v36  ;;  %v1111_v12 = vadd.f32 %v2602_v6, %v4100_v24  ;;  %v1109_v16 = vadd.f32 %v2602_v6, %v4102_v25 }
 0x205   : > { %v882_v27 = vpop.permute.xlu1 %881  ;;  %v872_v28 = vpop.permute.xlu0 %871 }
 0x206   : > { %v4104_v30 = vmul.f32 %v1098_v19, %v882_v27  ;;  %v4106_v31 = vmul.f32 %v1098_v19, %v872_v28  ;;  %v889_v34 = vmul.f32 %v887_v23, %v872_v28  ;;  %v891_v40 = vmul.f32 %v887_v23, %v882_v27 }
 0x208   : > { %v899_v41 = vadd.f32 %v2594_v33, %v889_v34  ;;  %v901_v50 = vadd.f32 %v2594_v33, %v891_v40  ;;  %v1112_v19 = vadd.f32 %v2602_v6, %v4104_v30  ;;  %v1110_v22 = vadd.f32 %v2602_v6, %v4106_v31  ;;  %v3126_v40 = vld [vmem:[#allocation17 + $0x18] sm:$0xff]   ;;  %v3130_v6 = vld [vmem:[#allocation23 + $0x18] sm:$0xff]  }
 0x209   : > { %v910_v35 = vpop.permute.xlu0 %909 }
 0x20a   : > { %v915_v38 = vpop.permute.xlu1 %914  ;;  %v931_v39 = vmul.f32 %v930_v32, %v910_v35 }
 0x20b   : > { %v932_v42 = vmul.f32 %v930_v32, %v915_v38 }
 0x20c   : > { %v935_v43 = vadd.f32 %v931_v39, %v898_v37  ;;  %v3125_v39 = vld [vmem:[#allocation17 + $0x10] sm:$0xff]  }
 0x20d   : > { %v936_v44 = vadd.f32 %v932_v42, %v899_v41  ;;  %v920_v45 = vpop.permute.xlu0 %919  ;;  %v3127_v41 = vld [vmem:[#allocation17] sm:$0xff]  }
 0x20e   : > { %v939_v47 = vmax.f32 %v935_v43, 0.0  ;;  %v925_v48 = vpop.permute.xlu1 %924  ;;  %v933_v49 = vmul.f32 %v930_v32, %v920_v45 }
 0x20f   : > { %v940_v51 = vmax.f32 %v936_v44, 0.0  ;;  %v934_v52 = vmul.f32 %v930_v32, %v925_v48 }
 0x210   : > { %946 = vst.msk [vmem:[#allocation3 + $0x1] sm:$0xff] %vm945_vm3, %v939_v47  ;;  %v937_v53 = vadd.f32 %v933_v49, %v900_v46  ;;  %v2603_v46 = vld [vmem:[#allocation16] ss:$0 sm:$0xff] }
 0x211   : > { %947 = vst.msk [vmem:[#allocation3 + $0x9] sm:$0xff] %vm945_vm3, %v940_v51  ;;  %v938_v54 = vadd.f32 %v934_v52, %v901_v50  ;;  %v950_v55 = vpack.c.bf16 %v940_v51, %v939_v47 }
 0x212   : > { %v941_v56 = vmax.f32 %v937_v53, 0.0 }
 0x213   : > { %v942_v57 = vmax.f32 %v938_v54, 0.0  ;;  %2734 = vmatprep.mubr.msk.bf16.mxu0 %vm945_vm3, %v950_v55 }
 0x214   : > { %948 = vst.msk [vmem:[#allocation3 + $0x11] sm:$0xff] %vm945_vm3, %v941_v56 }
 0x215   : > { %949 = vst.msk [vmem:[#allocation3 + $0x19] sm:$0xff] %vm945_vm3, %v942_v57  ;;  %v951_v58 = vpack.c.bf16 %v942_v57, %v941_v56 }
 0x217   : > { %2735 = vmatmul.mubr.msk.bf16.vlgmr.msra.gmra.mrb[0].mxu0 %vm945_vm3, %v951_v58  ;;  %v1019_v59 = vld [vmem:[#allocation3] sm:$0xff] }
 0x218   : > { %2739 = vmatpush3.bf16.msra.mxu0 %v3121_v11  ;;  %v1020_v60 = vld [vmem:[#allocation3 + $0x8] sm:$0xff] }
 0x219   : > { %v1023_v61 = vpack.c.bf16 %v1020_v60, %v1019_v59  ;;  %2744 = vmatprep.subr.bf16.mxu0 %v3122_v2 }
 0x21b   : > { %2740 = vmatprep.mubr.msk.bf16.mxu0 %vm945_vm3, %v1023_v61  ;;  %v1021_v62 = vld [vmem:[#allocation3 + $0x10] sm:$0xff] }
 0x21c   : > { %v1022_v63 = vld [vmem:[#allocation3 + $0x18] sm:$0xff] }
 0x21d   : > { %v1024_v0 = vpack.c.bf16 %v1022_v63, %v1021_v62  ;;  %v3128_v61 = vld [vmem:[#allocation17 + $0x8] sm:$0xff]  }
 0x223   : > { %2741 = vmatmul.mubr.msk.bf16.vlgmr.msra.gmra.mrb[0].mxu0 %vm945_vm3, %v1024_v0 }
 0x224   : > { %2745 = vmatpush3.bf16.msra.mxu0 %v3122_v2 }
 0x225   : > { %2750 = vmatprep.subr.bf16.mxu0 %v3124_v4 }
 0x2f6   : > { %v2742_v7 = vpop.f32.mrb[0].mxu0 }
 0x2f7   : > { %v2874_v8 = vadd.f32 %v2742_v7, %v2595_v5  ;;  %v1071_v9 = vpop.f32.mrb[1].mxu0  ;;  %v3131_v7 = vld [vmem:[#allocation23] sm:$0xff]  }
 0x2f8   : > { %v2875_v10 = vadd.f32 %v2595_v5, %v1071_v9  ;;  %v2743_v11 = vpop.f32.mrb[2].mxu0  ;;  %2786 = vmatprep.subr.bf16.mxu1 %v3131_v7  ;;  %v2610_v9 = vld [vmem:[#allocation19] ss:$0 sm:$0xff] }
 0x2f9   : > { %v1092_v13 = vmax.f32 %v2874_v8, 0.0  ;;  %v2876_v14 = vadd.f32 %v2743_v11, %v2595_v5  ;;  %v1074_v15 = vpop.f32.mrb[3].mxu0  ;;  %v3132_v8 = vld [vmem:[#allocation23 + $0x8] sm:$0xff]  }
 0x2fa   : > { %v1090_v17 = vmax.f32 %v2875_v10, 0.0  ;;  %v2877_v18 = vadd.f32 %v2595_v5, %v1074_v15  ;;  %v3129_v5 = vld [vmem:[#allocation23 + $0x10] sm:$0xff]   ;;  %v2619_v10 = vld [vmem:[#allocation22] ss:$0 sm:$0xff] }
 0x2fb   : > { %v1115_v20 = vadd.f32 %v1111_v12, %v1092_v13  ;;  %v1093_v21 = vmax.f32 %v2876_v14, 0.0 }
 0x2fc   : > { %v1113_v23 = vadd.f32 %v1109_v16, %v1090_v17  ;;  %v1091_v26 = vmax.f32 %v2877_v18, 0.0 }
 0x2fd   : > { %v1119_v27 = vmax.f32 %v1115_v20, 0.0  ;;  %v1116_v28 = vadd.f32 %v1112_v19, %v1093_v21 }
 0x2fe   : > { %v1117_v29 = vmax.f32 %v1113_v23, 0.0  ;;  %v1114_v32 = vadd.f32 %v1110_v22, %v1091_v26 }
 0x2ff   : > { %1125 = vst.msk [vmem:[#allocation4 + $0x12] sm:$0xff] %vm945_vm3, %v1119_v27  ;;  %v1120_v24 = vmax.f32 %v1116_v28, 0.0 }
 0x300   : > { %1123 = vst.msk [vmem:[#allocation4 + $0x2] sm:$0xff] %vm945_vm3, %v1117_v29  ;;  %v1118_v25 = vmax.f32 %v1114_v32, 0.0 }
 0x301   : > { %1126 = vst.msk [vmem:[#allocation4 + $0x1a] sm:$0xff] %vm945_vm3, %v1120_v24  ;;  %v1128_v33 = vpack.c.bf16 %v1120_v24, %v1119_v27 }
 0x302   : > { %1124 = vst.msk [vmem:[#allocation4 + $0xa] sm:$0xff] %vm945_vm3, %v1118_v25  ;;  %v1127_v30 = vpack.c.bf16 %v1118_v25, %v1117_v29 }
 0x304   : > { %2746 = vmatprep.mubr.msk.bf16.mxu0 %vm945_vm3, %v1127_v30  ;;  %2774 = vmatprep.mubr.msk.bf16.mxu1 %vm945_vm3, %v1127_v30 }
 0x305   : > { %2747 = vmatmul.mubr.msk.bf16.vlgmr.msra.gmra.mrb[4].mxu0 %vm945_vm3, %v1128_v33  ;;  %2775 = vmatmul.mubr.msk.bf16.vlgmr.msra.gmra.mrb[0].mxu1 %vm945_vm3, %v1128_v33 }
 0x306   : > { %2751 = vmatpush3.bf16.msra.mxu0 %v3124_v4  ;;  %2787 = vmatpush3.bf16.msra.mxu1 %v3131_v7 }
 0x307   : > { %v1196_v31 = vld [vmem:[#allocation4] sm:$0xff]  ;;  %2756 = vmatprep.subr.bf16.mxu0 %v3125_v39  ;;  %2788 = vmatprep.subr.bf16.mxu1 %v3132_v8 }
 0x308   : > { %v1199_v37 = vld [vmem:[#allocation4 + $0x18] sm:$0xff] }
 0x309   : > { %v1197_v34 = vld [vmem:[#allocation4 + $0x8] sm:$0xff]  ;;  %v1198_v36 = vld [vmem:[#allocation4 + $0x10] sm:$0xff] }
 0x30a   : > { %v1200_v35 = vpack.c.bf16 %v1197_v34, %v1196_v31  ;;  %v1201_v38 = vpack.c.bf16 %v1199_v37, %v1198_v36  ;;  %2789 = vmatpush3.bf16.msra.mxu1 %v3132_v8 }
 0x30b   : > { %2810 = vmatprep.subr.bf16.mxu1 %v3625_v1 }
 0x30c   : > { %2752 = vmatprep.mubr.msk.bf16.mxu0 %vm945_vm3, %v1200_v35 }
 0x311   : > { %2753 = vmatmul.mubr.msk.bf16.vlgmr.msra.gmra.mrb[4].mxu0 %vm945_vm3, %v1201_v38 }
 0x312   : > { %2757 = vmatpush3.bf16.msra.mxu0 %v3125_v39 }
 0x313   : > { %2758 = vmatprep.subr.bf16.mxu0 %v3126_v40 }
 0x316   : > { %2759 = vmatpush3.bf16.msra.mxu0 %v3126_v40 }
 0x317   : > { %2764 = vmatprep.subr.bf16.mxu0 %v3127_v41 }
 0x3d8   : > { %v2776_v42 = vpop.f32.mrb[0].mxu1 }
 0x3d9   : > { %v4135_v43 = vpop.f32.mrb[1].mxu1  ;;  %v1489_v16 = vadd.f32 %v2776_v42, %v2619_v10 }
 0x3da   : > { %v4137_v44 = vpop.f32.mrb[2].mxu1  ;;  %v1481_v20 = vadd.f32 %v2619_v10, %v4135_v43  ;;  %v3133_v43 = vld [vmem:[%s4365_s15 + $0x10] sm:$0xff]  }
 0x3db   : > { %v4139_v45 = vpop.f32.mrb[3].mxu1  ;;  %v1492_v23 = vadd.f32 %v4137_v44, %v2619_v10  ;;  %v3134_v44 = vld [vmem:[%s4365_s15 + $0x18] sm:$0xff]  }
 0x3dc   : > { %v1484_v28 = vadd.f32 %v2619_v10, %v4139_v45  ;;  %v3135_v45 = vld [vmem:[%s4365_s15] sm:$0xff]  }
 0x3e4   : > { %v2754_v47 = vpop.f32.mrb[4].mxu0 }
 0x3e5   : > { %v2878_v48 = vadd.f32 %v2754_v47, %v2603_v46  ;;  %v1248_v49 = vpop.f32.mrb[5].mxu0 }
 0x3e6   : > { %v2879_v50 = vadd.f32 %v2603_v46, %v1248_v49  ;;  %v2755_v51 = vpop.f32.mrb[6].mxu0 }
 0x3e7   : > { %v1269_v52 = vmax.f32 %v2878_v48, 0.0  ;;  %v2880_v53 = vadd.f32 %v2755_v51, %v2603_v46  ;;  %v1251_v54 = vpop.f32.mrb[7].mxu0 }
 0x3e8   : > { %v1267_v55 = vmax.f32 %v2879_v50, 0.0  ;;  %v2881_v56 = vadd.f32 %v2603_v46, %v1251_v54  ;;  %v2623_v50 = vld [vmem:[#allocation25] ss:$0 sm:$0xff] }
 0x3e9   : > { %1276 = vst.msk [vmem:[#allocation5 + $0x12] sm:$0xff] %vm1273_vm6, %v1269_v52  ;;  %v1270_v57 = vmax.f32 %v2880_v53, 0.0 }
 0x3ea   : > { %1274 = vst.msk [vmem:[#allocation5 + $0x2] sm:$0xff] %vm1273_vm6, %v1267_v55  ;;  %v1268_v58 = vmax.f32 %v2881_v56, 0.0 }
 0x3eb   : > { %1277 = vst.msk [vmem:[#allocation5 + $0x1a] sm:$0xff] %vm1273_vm6, %v1270_v57  ;;  %v1279_v59 = vpack.c.bf16 %v1270_v57, %v1269_v52 }
 0x3ec   : > { %1275 = vst.msk [vmem:[#allocation5 + $0xa] sm:$0xff] %vm1273_vm6, %v1268_v58  ;;  %v1278_v60 = vpack.c.bf16 %v1268_v58, %v1267_v55 }
 0x3ee   : > { %2760 = vmatprep.mubr.msk.bf16.mxu0 %vm1273_vm6, %v1278_v60 }
 0x3ef   : > { %2761 = vmatmul.mubr.msk.bf16.vlgmr.msra.gmra.mrb[8].mxu0 %vm1273_vm6, %v1279_v59 }
 0x3f0   : > { %2765 = vmatpush3.bf16.msra.mxu0 %v3127_v41 }
 0x3f1   : > { %2766 = vmatprep.subr.bf16.mxu0 %v3128_v61  ;;  %v1353_v62 = vld [vmem:[#allocation5] sm:$0xff] }
 0x3f2   : > { %v1356_v3 = vld [vmem:[#allocation5 + $0x18] sm:$0xff] }
 0x3f3   : > { %v1354_v63 = vld [vmem:[#allocation5 + $0x8] sm:$0xff]  ;;  %v1355_v2 = vld [vmem:[#allocation5 + $0x10] sm:$0xff] }
 0x3f4   : > { %2767 = vmatpush3.bf16.msra.mxu0 %v3128_v61  ;;  %v1357_v0 = vpack.c.bf16 %v1354_v63, %v1353_v62  ;;  %v1358_v4 = vpack.c.bf16 %v1356_v3, %v1355_v2 }
 0x3f5   : > { %2778 = vmatprep.subr.bf16.mxu0 %v3129_v5 }
 0x3f6   : > { %2768 = vmatprep.mubr.msk.bf16.mxu0 %vm1273_vm6, %v1357_v0 }
 0x3fb   : > { %2769 = vmatmul.mubr.msk.bf16.vlgmr.msra.gmra.mrb[8].mxu0 %vm1273_vm6, %v1358_v4 }
 0x3fc   : > { %2779 = vmatpush3.bf16.msra.mxu0 %v3129_v5 }
 0x3fd   : > { %2780 = vmatprep.subr.bf16.mxu0 %v3130_v6 }
 0x400   : > { %2781 = vmatpush3.bf16.msra.mxu0 %v3130_v6  ;;  %v3136_v6 = vld [vmem:[%s4365_s15 + $0x8] sm:$0xff]  }
 0x401   : > { %2794 = vmatprep.subr.bf16.mxu0 %v3133_v43 }
 0x4ce   : > { %v2770_v11 = vpop.f32.mrb[8].mxu0 }
 0x4cf   : > { %v2882_v12 = vadd.f32 %v2770_v11, %v2610_v9  ;;  %v1411_v13 = vpop.f32.mrb[9].mxu0 }
 0x4d0   : > { %v2883_v14 = vadd.f32 %v2610_v9, %v1411_v13  ;;  %v2771_v15 = vpop.f32.mrb[10].mxu0  ;;  %v3137_v13 = vld [vmem:[%s4431_s30] sm:$0xff]   ;;  %s766_s30 = sand.u32 1, %s4433_s3   ;;  %s3521_s3 = sshll.u32 %s3627_s22, 4  ;;  %s3522_s3 = int_to_ptr.vmem [resolvable:$false] %s3521_s3 }
 0x4d1   : > { %v1432_v17 = vmax.f32 %v2882_v12, 0.0  ;;  %v2884_v18 = vadd.f32 %v2771_v15, %v2610_v9  ;;  %v1414_v19 = vpop.f32.mrb[11].mxu0  ;;  %v2632_v15 = vld [vmem:[#allocation26] ss:$0 sm:$0xff]  ;;  %s767_s28 = scalar_lea.vmem [#allocation29], %s766_s30  ;;  %s2369_s1 = scalar_lea.sflag [#allocation10], %s766_s30 }
 0x4d2   : > { %v1430_v21 = vmax.f32 %v2883_v14, 0.0  ;;  %v2885_v22 = vadd.f32 %v2610_v9, %v1414_v19  ;;  %v3138_v14 = vld [vmem:[%s4432_s24 + $0x8] sm:$0xff]   ;;  %s2381_s25 = sshll.u32 %s767_s28, 4  ;;  %s3523_s26 = scalar_lea.vmem %s3522_s3, 32  ;;  %s4310_s25 = int_to_ptr.vmem [resolvable:$true] %s2381_s25 }
 0x4d3   : > { %v1497_v26 = vadd.f32 %v1489_v16, %v1432_v17  ;;  %v1433_v27 = vmax.f32 %v2884_v18, 0.0  ;;  %s3517_s27 = scalar_lea.vmem %s4310_s25, 16  ;;  %p3524_p12 = scmp.lt.s32.totalorder %s4310_s25, %s3522_s3 }
 0x4d4   : > { %v1495_v29 = vadd.f32 %v1481_v20, %v1430_v21  ;;  %v1431_v32 = vmax.f32 %v2885_v22, 0.0  ;;  %p3518_p0 = scmp.ne.s32.totalorder %s4310_s25, %s3517_s27  ;;  %p3525_p10 = scmp.lt.s32.totalorder %s3523_s26, %s3517_s27 }
 0x4d5   : > { %v4157_v24 = vmax.f32 %v1497_v26, 0.0  ;;  %v1498_v25 = vadd.f32 %v1492_v23, %v1433_v27 }
 0x4d6   : > { %v4159_v33 = vmax.f32 %v1495_v29, 0.0  ;;  %v1496_v30 = vadd.f32 %v1484_v28, %v1431_v32  ;;  %p3519_p5 = pnand %p3518_p0, %p4436_p6  ;;  %p3526_p2 = por %p3525_p10, %p3524_p12 }
 0x4d7   : > { %1507 = vst.msk [vmem:[#allocation6 + $0x14] sm:$0xff] %vm1273_vm6, %v4157_v24  ;;  %v4163_v31 = vmax.f32 %v1498_v25, 0.0 }
 0x4d8   : > { %1505 = vst.msk [vmem:[#allocation6 + $0x4] sm:$0xff] %vm1273_vm6, %v4159_v33  ;;  %v4167_v34 = vmax.f32 %v1496_v30, 0.0  ;;  %p3520_p9 = pneg %p3519_p5 }
 0x4d9   : > { %1508 = vst.msk [vmem:[#allocation6 + $0x1c] sm:$0xff] %vm1273_vm6, %v4163_v31  ;;  %v1510_v36 = vpack.c.bf16 %v4163_v31, %v4157_v24 }
 0x4da   : > { %1506 = vst.msk [vmem:[#allocation6 + $0xc] sm:$0xff] %vm1273_vm6, %v4167_v34  ;;  %v1509_v35 = vpack.c.bf16 %v4167_v34, %v4159_v33  ;;  %p3527_p3 = pnand %p3526_p2, %p3520_p9 }
 0x4dc   : > { %2782 = vmatprep.mubr.msk.bf16.mxu0 %vm1273_vm6, %v1509_v35 }
 0x4dd   : > { %2783 = vmatmul.mubr.msk.bf16.vlgmr.msra.gmra.mrb[12].mxu0 %vm1273_vm6, %v1510_v36 }
 0x4de   : > { %2795 = vmatpush3.bf16.msra.mxu0 %v3133_v43 }
 0x4df   : > { %v1584_v38 = vld [vmem:[#allocation6] sm:$0xff]  ;;  %2796 = vmatprep.subr.bf16.mxu0 %v3134_v44 }
 0x4e0   : > { %v1587_v37 = vld [vmem:[#allocation6 + $0x18] sm:$0xff] }
 0x4e1   : > { %v1585_v39 = vld [vmem:[#allocation6 + $0x8] sm:$0xff]  ;;  %v1586_v40 = vld [vmem:[#allocation6 + $0x10] sm:$0xff] }
 0x4e2   : > { %v1588_v41 = vpack.c.bf16 %v1585_v39, %v1584_v38  ;;  %v1589_v42 = vpack.c.bf16 %v1587_v37, %v1586_v40  ;;  %2797 = vmatpush3.bf16.msra.mxu0 %v3134_v44 }
 0x4e3   : > { %2802 = vmatprep.subr.bf16.mxu0 %v3135_v45 }
 0x4e4   : > { %2790 = vmatprep.mubr.msk.bf16.mxu1 %vm1273_vm6, %v1588_v41 }
 0x4e5   : > { %2791 = vmatmul.mubr.msk.bf16.vlgmr.msra.gmra.mrb[4].mxu1 %vm1273_vm6, %v1589_v42 }
 0x4e6   : > { %2811 = vmatpush3.bf16.msra.mxu1 %v3137_v13  ;;  %2814 = vmatprep.mubr.msk.bf16.mxu1 %vm3626_vm8, %v3625_v1 }
 0x4e7   : > { %2812 = vmatprep.subr.bf16.mxu1 %v3625_v1 }
 0x4ea   : > { %2813 = vmatpush3.bf16.msra.mxu1 %v3138_v14 }
 0x4eb   : > { %2818 = vmatprep.subr.bf16.mxu1 %v3625_v1 }
 0x5b0   : > { %v2784_v46 = vpop.f32.mrb[12].mxu0 }
 0x5b1   : > { %v1569_v47 = vpop.f32.mrb[13].mxu0  ;;  %v1578_v51 = vadd.f32 %v2784_v46, %v2623_v50 }
 0x5b2   : > { %v2785_v48 = vpop.f32.mrb[14].mxu0  ;;  %v1570_v52 = vadd.f32 %v2623_v50, %v1569_v47 }
 0x5b3   : > { %v1572_v49 = vpop.f32.mrb[15].mxu0  ;;  %v1581_v54 = vadd.f32 %v2785_v48, %v2623_v50 }
 0x5b4   : > { %v1573_v57 = vadd.f32 %v2623_v50, %v1572_v49 }
 0x5b8   : > { %v2792_v53 = vpop.f32.mrb[4].mxu1 }
 0x5b9   : > { %v1659_v55 = vadd.f32 %v2792_v53, %v1578_v51  ;;  %v1642_v56 = vpop.f32.mrb[5].mxu1  ;;  %v3140_v53 = vld [vmem:[%s4432_s24 + $0x18] sm:$0xff]  }
 0x5ba   : > { %v1657_v58 = vadd.f32 %v1642_v56, %v1570_v52  ;;  %v2793_v59 = vpop.f32.mrb[6].mxu1 }
 0x5bb   : > { %v1663_v60 = vmax.f32 %v1659_v55, 0.0  ;;  %v1660_v61 = vadd.f32 %v2793_v59, %v1581_v54  ;;  %v1645_v62 = vpop.f32.mrb[7].mxu1 }
 0x5bc   : > { %v1661_v63 = vmax.f32 %v1657_v58, 0.0  ;;  %v1658_v0 = vadd.f32 %v1645_v62, %v1573_v57  ;;  %v3141_v62 = vld [vmem:[%s4432_s24 + $0x20] sm:$0xff]  }
 0x5bd   : > { %1668 = vst.msk [vmem:[#allocation7 + $0x14] sm:$0xff] %vm1273_vm6, %v1663_v60  ;;  %v1664_v2 = vmax.f32 %v1660_v61, 0.0 }
 0x5be   : > { %1666 = vst.msk [vmem:[#allocation7 + $0x4] sm:$0xff] %vm1273_vm6, %v1661_v63  ;;  %v1662_v3 = vmax.f32 %v1658_v0, 0.0 }
 0x5bf   : > { %1669 = vst.msk [vmem:[#allocation7 + $0x1c] sm:$0xff] %vm1273_vm6, %v1664_v2  ;;  %v1671_v4 = vpack.c.bf16 %v1664_v2, %v1663_v60 }
 0x5c0   : > { %1667 = vst.msk [vmem:[#allocation7 + $0xc] sm:$0xff] %vm1273_vm6, %v1662_v3  ;;  %v1670_v5 = vpack.c.bf16 %v1662_v3, %v1661_v63 }
 0x5c2   : > { %2798 = vmatprep.mubr.msk.bf16.mxu0 %vm1273_vm6, %v1670_v5 }
 0x5c3   : > { %2799 = vmatmul.mubr.msk.bf16.vlgmr.msra.gmra.mrb[16].mxu0 %vm1273_vm6, %v1671_v4  ;;  %v3142_v4 = vld [vmem:[%s4432_s24 + $0x28] sm:$0xff]  }
 0x5c4   : > { %2803 = vmatpush3.bf16.msra.mxu0 %v3135_v45 }
 0x5c5   : > { %2804 = vmatprep.subr.bf16.mxu0 %v3136_v6  ;;  %v1745_v7 = vld [vmem:[#allocation7] sm:$0xff] }
 0x5c6   : > { %v1748_v11 = vld [vmem:[#allocation7 + $0x18] sm:$0xff] }
 0x5c7   : > { %v1746_v8 = vld [vmem:[#allocation7 + $0x8] sm:$0xff]  ;;  %v1747_v10 = vld [vmem:[#allocation7 + $0x10] sm:$0xff] }
 0x5c8   : > { %2805 = vmatpush3.bf16.msra.mxu0 %v3136_v6  ;;  %v1749_v9 = vpack.c.bf16 %v1746_v8, %v1745_v7  ;;  %v1750_v12 = vpack.c.bf16 %v1748_v11, %v1747_v10  ;;  %v3143_v10 = vld [vmem:[%s4432_s24 + $0x30] sm:$0xff]  }
 0x5ca   : > { %2806 = vmatprep.mubr.msk.bf16.mxu0 %vm1273_vm6, %v1749_v9 }
 0x5cf   : > { %2807 = vmatmul.mubr.msk.bf16.vlgmr.msra.gmra.mrb[16].mxu0 %vm1273_vm6, %v1750_v12 }
 0x6a2   : > { %v2808_v16 = vpop.f32.mrb[16].mxu0 }
 0x6a3   : > { %v1803_v17 = vpop.f32.mrb[17].mxu0  ;;  %v2894_v51 = vadd.f32 %v2808_v16, %v2632_v15 }
 0x6a4   : > { %v2895_v18 = vadd.f32 %v2632_v15, %v1803_v17  ;;  %v2809_v19 = vpop.f32.mrb[18].mxu0 }
 0x6a5   : > { %v4211_v20 = vadd.f32 %v2809_v19, %v2632_v15  ;;  %v1806_v21 = vpop.f32.mrb[19].mxu0  ;;  %v1824_v56 = vmax.f32 %v2894_v51, 0.0 }
 0x6a6   : > { %v1822_v22 = vmax.f32 %v2895_v18, 0.0  ;;  %v2897_v23 = vadd.f32 %v2632_v15, %v1806_v21  ;;  %v3144_v15 = vld [vmem:[%s4432_s24 + $0x38] sm:$0xff]  }
 0x6a7   : > { %v1828_v61 = vadd.f32 %v1824_v56, %v4157_v24  ;;  %v1825_v19 = vmax.f32 %v4211_v20, 0.0  ;;  %v3146_v20 = vld [vmem:[%s4432_s24 + $0x48] sm:$0xff]  }
 0x6a8   : > { %v1826_v26 = vadd.f32 %v1822_v22, %v4159_v33  ;;  %v1823_v27 = vmax.f32 %v2897_v23, 0.0 }
 0x6a9   : > { %v1832_v3 = vmax.f32 %v1828_v61, 0.0  ;;  %v3152_v61 = vld [vmem:[%s4432_s24 + $0x78] sm:$0xff]  }
 0x6aa   : > { %v1830_v28 = vmax.f32 %v1826_v26, 0.0  ;;  %v1827_v25 = vadd.f32 %v1823_v27, %v4167_v34  ;;  %v3139_v34 = vld [vmem:[%s4432_s24 + $0x10] sm:$0xff]   ;;  %v1829_v26 = vadd.f32 %v1825_v19, %v4163_v31  ;;  %v3145_v27 = vld [vmem:[%s4432_s24 + $0x40] sm:$0xff]  }
 0x6ab   : > { %v2100_v6 = vsel %vm1503_vm7, %v1832_v3, 0.0  ;;  %v2166_v14 = vrot.slane %v1832_v3, 4 }
 0x6ac   : > { %v1834_v29 = vsel %vm1503_vm7, %v1830_v28, 0.0  ;;  %v1900_v32 = vrot.slane %v1830_v28, 4  ;;  %v1831_v38 = vmax.f32 %v1827_v25, 0.0  ;;  %v2101_v7 = vrot.slane %v2100_v6, 4 }
 0x6ad   : > { %v1835_v30 = vrot.slane %v1834_v29, 4  ;;  %v2168_v18 = vsel %vm1503_vm7, %v2166_v14, 0.0  ;;  %v1833_v25 = vmax.f32 %v1829_v26, 0.0 }
 0x6ae   : > { %v1902_v35 = vsel %vm1503_vm7, %v1900_v32, 0.0  ;;  %v1967_v43 = vsel %vm1503_vm7, %v1831_v38, 0.0  ;;  %v2033_v52 = vrot.slane %v1831_v38, 4  ;;  %v2102_v11 = vadd.f32 %v2101_v7, %v2100_v6 }
 0x6af   : > { %v1836_v36 = vadd.f32 %v1835_v30, %v1834_v29  ;;  %v1903_v37 = vrot.slane %v1902_v35, 4  ;;  %v1968_v46 = vrot.slane %v1967_v43, 4  ;;  %v2169_v22 = vrot.slane %v2168_v18, 4 }
 0x6b0   : > { %v2035_v57 = vsel %vm1503_vm7, %v2033_v52, 0.0  ;;  %v2103_v16 = vrot.slane %v2102_v11, 2 }
 0x6b1   : > { %v1837_v39 = vrot.slane %v1836_v36, 2  ;;  %v1904_v40 = vadd.f32 %v1903_v37, %v1902_v35  ;;  %v1969_v50 = vadd.f32 %v1968_v46, %v1967_v43  ;;  %v2036_v59 = vrot.slane %v2035_v57, 4 }
 0x6b2   : > { %v2104_v21 = vadd.f32 %v2103_v16, %v2102_v11  ;;  %v2170_v29 = vadd.f32 %v2169_v22, %v2168_v18  ;;  %v2233_v35 = vsel %vm1503_vm7, %v1833_v25, 0.0  ;;  %v2299_v43 = vrot.slane %v1833_v25, 4 }
 0x6b3   : > { %v1838_v41 = vadd.f32 %v1837_v39, %v1836_v36  ;;  %v1905_v42 = vrot.slane %v1904_v40, 2  ;;  %v1970_v55 = vrot.slane %v1969_v50, 2  ;;  %v2037_v0 = vadd.f32 %v2036_v59, %v2035_v57  ;;  %v3147_v39 = vld [vmem:[%s4432_s24 + $0x50] sm:$0xff]  }
 0x6b4   : > { %v2105_v28 = vrot.slane %v2104_v21, 1  ;;  %v2171_v31 = vrot.slane %v2170_v29, 2  ;;  %v2234_v38 = vrot.slane %v2233_v35, 4  ;;  %v2301_v46 = vsel %vm1503_vm7, %v2299_v43, 0.0 }
 0x6b5   : > { %v1839_v33 = vrot.slane %v1838_v41, 1  ;;  %v1906_v45 = vadd.f32 %v1905_v42, %v1904_v40  ;;  %v1971_v58 = vadd.f32 %v1970_v55, %v1969_v50  ;;  %v2038_v24 = vrot.slane %v2037_v0, 2 }
 0x6b6   : > { %v2106_v30 = vadd.f32 %v2105_v28, %v2104_v21  ;;  %v2172_v37 = vadd.f32 %v2171_v31, %v2170_v29  ;;  %v2235_v42 = vadd.f32 %v2234_v38, %v2233_v35 }
 0x6b7   : > { %v1840_v44 = vadd.f32 %v1839_v33, %v1838_v41  ;;  %v1907_v49 = vrot.slane %v1906_v45, 1  ;;  %v1972_v63 = vrot.slane %v1971_v58, 1  ;;  %v2039_v9 = vadd.f32 %v2038_v24, %v2037_v0  ;;  %v3148_v33 = vld [vmem:[%s4432_s24 + $0x58] sm:$0xff]  }
 0x6b8   : > { %v2107_v36 = vmul.f32 0.25, %v2106_v30  ;;  %v2173_v41 = vrot.slane %v2172_v37, 1 }
 0x6b9   : > { %v1841_v47 = vmul.f32 0.25, %v1840_v44  ;;  %v1908_v54 = vadd.f32 %v1907_v49, %v1906_v45  ;;  %v1973_v5 = vadd.f32 %v1972_v63, %v1971_v58  ;;  %v2040_v13 = vrot.slane %v2039_v9, 1  ;;  %v3149_v49 = vld [vmem:[%s4432_s24 + $0x60] sm:$0xff]   ;;  %v3151_v58 = vld [vmem:[%s4432_s24 + $0x70] sm:$0xff]  }
 0x6ba   : > { %v2108_v40 = vpack.c.bf16 %v2107_v36, %v2107_v36  ;;  %v2174_v44 = vadd.f32 %v2173_v41, %v2172_v37  ;;  %v2236_v45 = vrot.slane %v2235_v42, 2 }
 0x6bb   : > { %v1842_v48 = vpack.c.bf16 %v1841_v47, %v1841_v47  ;;  %v1909_v60 = vmul.f32 0.25, %v1908_v54  ;;  %v1974_v8 = vmul.f32 0.25, %v1973_v5  ;;  %v2041_v17 = vadd.f32 %v2040_v13, %v2039_v9 }
 0x6bc   : > { %v2237_v47 = vadd.f32 %v2236_v45, %v2235_v42 }
 0x6bd   : > { %2815 = vmatmul.mubr.msk.bf16.vlgmr.msra.gmra.mrb[8].mxu1 %vm1273_vm6, %v1842_v48  ;;  %v1910_v2 = vpack.c.bf16 %v1909_v60, %v1909_v60  ;;  %v1975_v12 = vpack.c.bf16 %v1974_v8, %v1974_v8  ;;  %v2042_v23 = vmul.f32 0.25, %v2041_v17  ;;  %v2175_v48 = vmul.f32 0.25, %v2174_v44 }
 0x6be   : > { %2819 = vmatpush3.bf16.msra.mxu1 %v3139_v34  ;;  %2822 = vmatprep.mubr.msk.bf16.mxu1 %vm3626_vm8, %v3625_v1  ;;  %v2302_v34 = vrot.slane %v2301_v46, 4  ;;  %v2238_v50 = vrot.slane %v2237_v47, 1 }
 0x6bf   : > { %2820 = vmatprep.subr.bf16.mxu1 %v3625_v1  ;;  %v2043_v32 = vpack.c.bf16 %v2042_v23, %v2042_v23  ;;  %v2176_v52 = vpack.c.bf16 %v2175_v48, %v2175_v48 }
 0x6c0   : > { %v2303_v51 = vadd.f32 %v2302_v34, %v2301_v46  ;;  %v2239_v54 = vadd.f32 %v2238_v50, %v2237_v47 }
 0x6c2   : > { %2821 = vmatpush3.bf16.msra.mxu1 %v3140_v53  ;;  %v3150_v53 = vld [vmem:[%s4432_s24 + $0x68] sm:$0xff]   ;;  %v2304_v55 = vrot.slane %v2303_v51, 2  ;;  %v2240_v56 = vmul.f32 0.25, %v2239_v54 }
 0x6c3   : > { %2826 = vmatprep.subr.bf16.mxu1 %v3625_v1 }
 0x6c4   : > { %v2305_v57 = vadd.f32 %v2304_v55, %v2303_v51  ;;  %v2241_v59 = vpack.c.bf16 %v2240_v56, %v2240_v56 }
 0x6c6   : > { %v2306_v60 = vrot.slane %v2305_v57, 1 }
 0x6c9   : > { %2823 = vmatmul.mubr.msk.bf16.vlgmr.msra.gmra.mrb[8].mxu1 %vm1273_vm6, %v1910_v2  ;;  %v851_v2 = vld [vmem:[#allocation28] sm:$0x1] }
 0x6ca   : > { %2827 = vmatpush3.bf16.msra.mxu1 %v3141_v62  ;;  %2830 = vmatprep.mubr.msk.bf16.mxu1 %vm3626_vm8, %v3625_v1  ;;  %v2307_v62 = vadd.f32 %v2306_v60, %v2305_v57 }
 0x6cb   : > { %2828 = vmatprep.subr.bf16.mxu1 %v3625_v1 }
 0x6cc   : > { %v2308_v63 = vmul.f32 0.25, %v2307_v62 }
 0x6ce   : > { %2829 = vmatpush3.bf16.msra.mxu1 %v3142_v4  ;;  %v2309_v0 = vpack.c.bf16 %v2308_v63, %v2308_v63 }
 0x6cf   : > { %2834 = vmatprep.subr.bf16.mxu1 %v3625_v1 }
 0x6d5   : > { %2831 = vmatmul.mubr.msk.bf16.vlgmr.msra.gmra.mrb[8].mxu1 %vm1273_vm6, %v1975_v12 }
 0x6d6   : > { %2835 = vmatpush3.bf16.msra.mxu1 %v3143_v10  ;;  %2838 = vmatprep.mubr.msk.bf16.mxu1 %vm3626_vm8, %v3625_v1 }
 0x6d7   : > { %2836 = vmatprep.subr.bf16.mxu1 %v3625_v1 }
 0x6da   : > { %2837 = vmatpush3.bf16.msra.mxu1 %v3144_v15 }
 0x6db   : > { %2842 = vmatprep.subr.bf16.mxu1 %v3625_v1 }
 0x6e1   : > { %2839 = vmatmul.mubr.msk.bf16.vlgmr.msra.gmra.mrb[8].mxu1 %vm1273_vm6, %v2043_v32 }
 0x6e2   : > { %2843 = vmatpush3.bf16.msra.mxu1 %v3145_v27  ;;  %2846 = vmatprep.mubr.msk.bf16.mxu1 %vm3626_vm8, %v3625_v1 }
 0x6e3   : > { %2844 = vmatprep.subr.bf16.mxu1 %v3625_v1 }
 0x6e6   : > { %2845 = vmatpush3.bf16.msra.mxu1 %v3146_v20 }
 0x6e7   : > { %2850 = vmatprep.subr.bf16.mxu1 %v3625_v1 }
 0x6ed   : > { %2847 = vmatmul.mubr.msk.bf16.vlgmr.msra.gmra.mrb[8].mxu1 %vm1273_vm6, %v2108_v40 }
 0x6ee   : > { %2851 = vmatpush3.bf16.msra.mxu1 %v3147_v39  ;;  %2854 = vmatprep.mubr.msk.bf16.mxu1 %vm3626_vm8, %v3625_v1 }
 0x6ef   : > { %2852 = vmatprep.subr.bf16.mxu1 %v3625_v1 }
 0x6f2   : > { %2853 = vmatpush3.bf16.msra.mxu1 %v3148_v33 }
 0x6f3   : > { %2858 = vmatprep.subr.bf16.mxu1 %v3625_v1 }
 0x6f9   : > { %2855 = vmatmul.mubr.msk.bf16.vlgmr.msra.gmra.mrb[8].mxu1 %vm1273_vm6, %v2176_v52 }
 0x6fa   : > { %2859 = vmatpush3.bf16.msra.mxu1 %v3149_v49  ;;  %2862 = vmatprep.mubr.msk.bf16.mxu1 %vm3626_vm8, %v3625_v1 }
 0x6fb   : > { %2860 = vmatprep.subr.bf16.mxu1 %v3625_v1 }
 0x6fe   : > { %2861 = vmatpush3.bf16.msra.mxu1 %v3150_v53 }
 0x6ff   : > { %2866 = vmatprep.subr.bf16.mxu1 %v3625_v1 }
 0x705   : > { %2863 = vmatmul.mubr.msk.bf16.vlgmr.msra.gmra.mrb[8].mxu1 %vm1273_vm6, %v2241_v59 }
 0x706   : > { %2867 = vmatpush3.bf16.msra.mxu1 %v3151_v58  ;;  %2870 = vmatprep.mubr.msk.bf16.mxu1 %vm3626_vm8, %v3625_v1 }
 0x707   : > { %2868 = vmatprep.subr.bf16.mxu1 %v3625_v1 }
 0x70a   : > { %2869 = vmatpush3.bf16.msra.mxu1 %v3152_v61 }
 0x711   : > { %2871 = vmatmul.mubr.msk.bf16.vlgmr.msra.gmra.mrb[8].mxu1 %vm1273_vm6, %v2309_v0 }
 0x7e4   : > { %v2359_v3 = vpop.f32.mrb[8].mxu1 }
 0x7e5   : > { %v2898_v4 = vadd.f32 %v2359_v3, %v851_v2  ;;  %v2872_v5 = vpop.f32.mrb[9].mxu1 }
 0x7e6   : > { %v2362_v1 = vpop.f32.mrb[10].mxu1 }
 0x7e7   : > { %v2873_v24 = vpop.f32.mrb[11].mxu1  ;;  %2367 = vst.msk [vmem:[%s767_s28] sm:$0x1] %vm2366_vm9, %v2898_v4 }
 0x7e8   : > { %3530 = shalt.err (!%p3527_p3)
}
 0x7e9   : > { %s3531_s7 = scalar_lea.hbm %s4308_s19, 16  ;;  %s3535_s30 = scalar_lea.hbm %s4435_s9, 32 }
 0x7ea   : > { %p3532_p4 = scmp.ne.s32.totalorder %s4308_s19, %s3531_s7  ;;  %p3536_p11 = scmp.lt.u32.totalorder %s4308_s19, %s4435_s9 }
 0x7eb   : > { %p3537_p13 = scmp.lt.u32.totalorder %s3535_s30, %s3531_s7  ;;  %p3539_p0 = scmp.lt.u32.totalorder %s3531_s7, %s4308_s19 }
 0x7ec   : > { %p3533_p7 = pnand %p3532_p4, %p4436_p6 }
 0x7ed   : > { %p3538_p1 = por %p3537_p13, %p3536_p11 }
 0x7ee   : > { %p3534_p8 = pneg %p3533_p7 }
 0x7ef   : > { %p3540_p5 = por %p3539_p0, %p3538_p1 }
 0x7f1   : > { %p3541_p9 = pnand %p3540_p5, %p3534_p8 }
 0x7f3   : > { %3544 = shalt.err (!%p3541_p9)
}
 0x7f4   : > { %2995 = dma.vmem_to_hbm [thread:$0]  (%p4436_p6), %s4310_s25, 16, %s4308_s19, %s2369_s1  }
 0x7f5 PF: > { %s4437_s17 = sld [smem:[#allocation41_spill]]  ;;  %s4438_s20 = sld [smem:[#allocation38_spill]] }
 0x7f6   : > { %s4439_s27 = sld [smem:[#allocation45_spill]] }
 0x7fb   : > { %p3067_p12 = scmp.ge.s32.totalorder %s4437_s17, 2  ;;  %s2393_s22 = sand.u32 1, %s4438_s20  }
 0x7fc   : > { %p4440_p10 = scmp.ne.s32.totalorder %s4439_s27, 0  ;;  %s2394_s3 = scalar_lea.sflag [#allocation10], %s2393_s22 }
 0x7fe   : > { %p3038_p2 = pnand %p3067_p12, %p4440_p10 }
 0x800   : > { %3590 = dma.done.wait (!%p3038_p2), %s2394_s3, 16  }
 0x801   : > { %3592 = vsyncadd (!%p3038_p2), %s2394_s3, 4294967280  ;;  %s4441_s21 = sld [smem:[#allocation42_spill]]  ;;  %s4442_s0 = sld [smem:[#allocation39_spill]] }
 0x802   : > { %s4443_s30 = sld [smem:[#allocation40_spill]]  ;;  %s4444_s20 = sld [smem:[#allocation43_spill]] }
 0x807   : > { %p36_p3 = scmp.ge.s32.totalorder %s4441_s21, 4  }
 0x809   :  { %38 = sbr.rel (!%p36_p3) target bundleno = 20 (0x14), region = 184 }
 0x810   :  { %2398 = vsyncpa [#allocation9], 1 }
 0x811   :  { %2400 = vsyncpa [#allocation9 + $0x1], 1 }
 0x812   :  { %2401 = vsyncpa [#allocation12], 1 }
 0x813   :  { %2402 = vsyncpa [#allocation15], 1 }
 0x814   :  { %2403 = vsyncpa [#allocation18], 1 }
 0x815   :  { %2404 = vsyncpa [#allocation21], 1 }
 0x816   :  { %2405 = vsyncpa [#allocation24], 1 }
 0x817   :  { %2406 = vsyncpa [#allocation27], 1 }
 0x818   :  { %2407 = vsyncpa [#allocation10], 1 }
 0x819   :  { %2409 = vsyncpa [#allocation10 + $0x1], 1 }

</bundles_post_ra>
